<compile_context>
chip_gen: v7x
topology: tpu7x:2x2x1
jax: 0.10.0
libtpu: 0.0.40
codegen_flags: <defaults>
</compile_context>

<pallas_src>
import functools
import math

import jax
import jax.numpy as jnp
from jax import lax
from jax.experimental import pallas as pl
from jax.experimental.pallas import tpu as pltpu

D_MODEL = 32
N_HEADS = 4
D_FF = 64
N_LAYERS = 2
EPS = 1e-6          # LayerNorm eps (Annotated Transformer default)
NEG_INF = -1e9


# ----------------------------- in-kernel math helpers -----------------------------
def _layer_norm(z, g, b):
    # Annotated-Transformer LayerNorm: torch.std is unbiased (ddof=1) and eps is
    # added to std (not variance). Do NOT "fix" to the variance+eps form.
    mean = jnp.mean(z, axis=-1, keepdims=True)
    c = z - mean
    var = jnp.sum(c * c, axis=-1, keepdims=True) * (1.0 / (z.shape[-1] - 1))
    inv = pl.reciprocal(jnp.sqrt(var) + EPS)            # exact reciprocal
    return g * (c * inv) + b


def _attention(q, k, v, bias, wo, bo, h):
    """Attention over batch-folded rows.

    q: (R, D) scaled queries; k, v: (Rk, D); bias: (R, Rk) additive mask bias that
    already encodes the batch-block-diagonal structure + tgt/src mask. Per head:
    one dot_general score matmul (no transpose materialized) and one P@V matmul;
    heads are assembled once and a single full-width Wo matmul finishes.
    """
    d = q.shape[-1]
    dk = d // h
    pv = []
    for hi in range(h):                                   # static loop, h small
        sl = slice(hi * dk, (hi + 1) * dk)
        s = lax.dot_general(
            q[:, sl], k[:, sl],
            dimension_numbers=(((1,), (1,)), ((), ())),   # contract dim 1 of both
            preferred_element_type=jnp.float32) + bias
        s = s - jnp.max(s, axis=-1, keepdims=True)        # stable softmax
        e = jnp.exp(s)
        p = e * pl.reciprocal(jnp.sum(e, axis=-1, keepdims=True))   # exact
        pv.append(jnp.dot(p, v[:, sl], preferred_element_type=jnp.float32))
    o = jnp.concatenate(pv, axis=-1)                      # (R, D)
    return jnp.dot(o, wo, preferred_element_type=jnp.float32) + bo


# --------------------------------- fused kernel ------------------------------------
def decoder_kernel(x_ref, mem_ref, sbias_ref, xbias_ref,
                   wqkv_ref, bqkv_ref, wq_ref, bq_ref, wkv_ref, bkv_ref,
                   wo_ref, bo_ref, ln_ref,
                   w1_ref, b1_ref, w2_ref, b2_ref,
                   fg_ref, fb_ref,
                   out_ref, x_scr, *, h):
    # grid = (batch_blocks, n_layers); one decoder layer per step along axis 1.
    l = pl.program_id(1)
    n_layers = pl.num_programs(1)

    @pl.when(l == 0)
    def _():
        x_scr[...] = x_ref[0]                             # load activation carry

    x = x_scr[...]                                        # (R, D) = (B_blk*T, D)
    mem = mem_ref[0]                                      # (RS, D) = (B_blk*S, D)
    self_bias = sbias_ref[0]                              # (R, R)  additive bias
    src_bias = xbias_ref[0]                               # (R, RS) additive bias
    d = x.shape[-1]

    # ---- sublayer 0: x + self_attn(norm(x))   (dropout = identity, eval mode) ----
    xn = _layer_norm(x, ln_ref[0, 0], ln_ref[0, 1])
    qkv = jnp.dot(xn, wqkv_ref[0], preferred_element_type=jnp.float32) + bqkv_ref[0]
    x = x + _attention(qkv[:, :d], qkv[:, d:2 * d], qkv[:, 2 * d:],
                       self_bias, wo_ref[0, 0], bo_ref[0, 0], h)

    # ---- sublayer 1: x + src_attn(norm(x), memory) ----
    xn = _layer_norm(x, ln_ref[0, 2], ln_ref[0, 3])
    q = jnp.dot(xn, wq_ref[0], preferred_element_type=jnp.float32) + bq_ref[0]
    kv = jnp.dot(mem, wkv_ref[0], preferred_element_type=jnp.float32) + bkv_ref[0]
    x = x + _attention(q, kv[:, :d], kv[:, d:],
                       src_bias, wo_ref[0, 1], bo_ref[0, 1], h)

    # ---- sublayer 2: x + FFN(norm(x)) ; FFN = w2(relu(w1(x))) ----
    xn = _layer_norm(x, ln_ref[0, 4], ln_ref[0, 5])
    hdn = jnp.maximum(
        jnp.dot(xn, w1_ref[0], preferred_element_type=jnp.float32) + b1_ref[0], 0.0)
    x = x + jnp.dot(hdn, w2_ref[0], preferred_element_type=jnp.float32) + b2_ref[0]

    x_scr[...] = x                                        # carry to next layer step

    @pl.when(l == n_layers - 1)
    def _():
        # final LayerNorm epilogue; output block is flushed once per batch block.
        out_ref[0] = _layer_norm(x, fg_ref[...], fb_ref[...])


# --------------------------------- wrappers ------------------------------------------
def pack_params(p, h):
    """One-time host-side parameter packing: fused QKV/KV, 1/sqrt(dk) folded into Q."""
    d = p["attn_w"].shape[-1]
    scale = 1.0 / math.sqrt(d // h)
    aw, ab = p["attn_w"], p["attn_b"]                     # (L,8,D,D), (L,8,1,D)
    return {
        "w_self_qkv": jnp.concatenate([aw[:, 0] * scale, aw[:, 1], aw[:, 2]], axis=-1),
        "b_self_qkv": jnp.concatenate([ab[:, 0] * scale, ab[:, 1], ab[:, 2]], axis=-1),
        "w_src_q": aw[:, 4] * scale,
        "b_src_q": ab[:, 4] * scale,
        "w_src_kv": jnp.concatenate([aw[:, 5], aw[:, 6]], axis=-1),
        "b_src_kv": jnp.concatenate([ab[:, 5], ab[:, 6]], axis=-1),
        "w_o": jnp.stack([aw[:, 3], aw[:, 7]], axis=1),   # (L,2,D,D)  [self, src]
        "b_o": jnp.stack([ab[:, 3], ab[:, 7]], axis=1),   # (L,2,1,D)
        "ln": p["ln"],
        "ffn_w1": p["ffn_w1"], "ffn_b1": p["ffn_b1"],
        "ffn_w2": p["ffn_w2"], "ffn_b2": p["ffn_b2"],
        "final_g": p["final_g"], "final_b": p["final_b"],
    }


def decoder_forward(x, memory, tgt_mask, src_mask, pk):
    # TODO(synk): incremental_state (decode-time KV caching) is inference plumbing;
    # full-sequence forward implemented only.
    B, T, D = x.shape
    S = memory.shape[1]
    L = pk["w_self_qkv"].shape[0]
    F = pk["ffn_w1"].shape[-1]

    # Batch blocking: fold the whole (tiny) batch into one block so every row-wise
    # matmul sees B*T sublane rows. With a larger B this would become several
    # batch blocks on the leading ("parallel") grid axis.
    nb = 1
    R, RS = B * T, B * S
    x2 = x.reshape(nb, R, D)
    mem2 = memory.reshape(nb, RS, D)

    # Host-side additive attention biases: batch-block-diagonal masking lets the
    # kernel compute one (R, Rk) score matmul per head covering all batch rows,
    # and removes all mask compare/select from the kernel's serial chain.
    rb = jnp.arange(R) // T                               # batch id of query rows
    cb_t = jnp.arange(R) // T                             # batch id of self-attn keys
    cb_s = jnp.arange(RS) // S                            # batch id of memory rows
    tgt_tiled = jnp.tile(tgt_mask, (B, B))                # (R,R): block (b,b') = tgt_mask
    self_bias = jnp.where((rb[:, None] == cb_t[None, :]) & (tgt_tiled != 0),
                          0.0, NEG_INF).astype(jnp.float32).reshape(nb, R, R)
    srcm = src_mask.reshape(B * S)
    src_bias = jnp.where((rb[:, None] == cb_s[None, :]) & (srcm[None, :] != 0),
                         0.0, NEG_INF).astype(jnp.float32).reshape(nb, R, RS)

    kernel = functools.partial(decoder_kernel, h=N_HEADS)

    # Spec helpers: per-layer weights indexed by the layer grid axis; per-batch-block
    # activations/biases indexed by the batch-block axis; constants fixed at block 0.
    def wspec(*shape):
        return pl.BlockSpec((1,) + shape, lambda bb, l, s=len(shape): (l,) + (0,) * s)

    def bbspec(*shape):
        return pl.BlockSpec((1,) + shape, lambda bb, l, s=len(shape): (bb,) + (0,) * s)

    def cspec(*shape):
        return pl.BlockSpec(shape, lambda bb, l, s=len(shape): (0,) * s)

    out = pl.pallas_call(
        kernel,
        out_shape=jax.ShapeDtypeStruct((nb, R, D), jnp.float32),
        grid=(nb, L),
        in_specs=[
            bbspec(R, D),          # x (read at l==0 only)
            bbspec(RS, D),         # memory
            bbspec(R, R),          # self-attn additive bias
            bbspec(R, RS),         # src-attn additive bias
            wspec(D, 3 * D),       # fused self QKV weight (scale folded into Q cols)
            wspec(1, 3 * D),       # fused self QKV bias
            wspec(D, D),           # src Q weight (scale folded)
            wspec(1, D),           # src Q bias
            wspec(D, 2 * D),       # fused src KV weight
            wspec(1, 2 * D),       # fused src KV bias
            wspec(2, D, D),        # output projections [self, src]
            wspec(2, 1, D),        # output projection biases
            wspec(6, 1, D),        # layer-norm g/b x3
            wspec(D, F),           # ffn w1
            wspec(1, F),           # ffn b1
            wspec(F, D),           # ffn w2
            wspec(1, D),           # ffn b2
            cspec(1, D),           # final norm g
            cspec(1, D),           # final norm b
        ],
        out_specs=bbspec(R, D),
        scratch_shapes=[pltpu.VMEM((R, D), jnp.float32)],   # activation carry
        compiler_params=pltpu.CompilerParams(
            dimension_semantics=("parallel", "arbitrary")),
    )(x2, mem2, self_bias, src_bias,
      pk["w_self_qkv"], pk["b_self_qkv"], pk["w_src_q"], pk["b_src_q"],
      pk["w_src_kv"], pk["b_src_kv"], pk["w_o"], pk["b_o"], pk["ln"],
      pk["ffn_w1"], pk["ffn_b1"], pk["ffn_w2"], pk["ffn_b2"],
      pk["final_g"], pk["final_b"])
    return out.reshape(B, T, D)


# ----------------------------- pure-JAX reference -----------------------------------
def _ref_layer_norm(z, g, b):
    mean = jnp.mean(z, axis=-1, keepdims=True)
    var = jnp.sum((z - mean) ** 2, axis=-1, keepdims=True) / (z.shape[-1] - 1)
    return g * (z - mean) / (jnp.sqrt(var) + EPS) + b


def _ref_mha(q_in, kv_in, mask, wq, wk, wv, wo, bq, bk, bv, bo, h):
    d = q_in.shape[-1]
    dk = d // h
    q = q_in @ wq + bq
    k = kv_in @ wk + bk
    v = kv_in @ wv + bv
    outs = []
    for hi in range(h):
        sl = slice(hi * dk, (hi + 1) * dk)
        s = (q[:, sl] @ k[:, sl].T) / math.sqrt(dk)
        s = jnp.where(mask == 0, -1e9, s)
        p = jax.nn.softmax(s, axis=-1)
        outs.append(p @ v[:, sl])
    return jnp.concatenate(outs, axis=-1) @ wo + bo


def decoder_reference(x, memory, tgt_mask, src_mask, p, h):
    L = p["attn_w"].shape[0]
    outs = []
    for b in range(x.shape[0]):
        xb, mb, sm = x[b], memory[b], src_mask[b]
        for l in range(L):
            ln, aw, ab = p["ln"][l], p["attn_w"][l], p["attn_b"][l]
            xn = _ref_layer_norm(xb, ln[0], ln[1])
            xb = xb + _ref_mha(xn, xn, tgt_mask,
                               aw[0], aw[1], aw[2], aw[3],
                               ab[0], ab[1], ab[2], ab[3], h)
            xn = _ref_layer_norm(xb, ln[2], ln[3])
            xb = xb + _ref_mha(xn, mb, sm,
                               aw[4], aw[5], aw[6], aw[7],
                               ab[4], ab[5], ab[6], ab[7], h)
            xn = _ref_layer_norm(xb, ln[4], ln[5])
            hdn = jnp.maximum(xn @ p["ffn_w1"][l] + p["ffn_b1"][l], 0.0)
            xb = xb + hdn @ p["ffn_w2"][l] + p["ffn_b2"][l]
        outs.append(_ref_layer_norm(xb, p["final_g"], p["final_b"]))
    return jnp.stack(outs, axis=0)


# --------------------------------- init / main --------------------------------------
def init_params(key, n_layers, d_model, d_ff):
    ks = jax.random.split(key, 7)
    ln_unit = jnp.stack([jnp.ones((1, d_model), jnp.float32),
                         jnp.zeros((1, d_model), jnp.float32)] * 3, axis=0)   # (6,1,D)
    params = {
        "attn_w": jax.random.normal(ks[0], (n_layers, 8, d_model, d_model), jnp.float32) * 0.05,
        "attn_b": jax.random.normal(ks[1], (n_layers, 8, 1, d_model), jnp.float32) * 0.02,
        "ln": jnp.tile(ln_unit[None], (n_layers, 1, 1, 1)),                    # (L,6,1,D)
        "ffn_w1": jax.random.normal(ks[2], (n_layers, d_model, d_ff), jnp.float32) * 0.05,
        "ffn_b1": jax.random.normal(ks[3], (n_layers, 1, d_ff), jnp.float32) * 0.02,
        "ffn_w2": jax.random.normal(ks[4], (n_layers, d_ff, d_model), jnp.float32) * 0.05,
        "ffn_b2": jax.random.normal(ks[5], (n_layers, 1, d_model), jnp.float32) * 0.02,
        "final_g": jnp.ones((1, d_model), jnp.float32),
        "final_b": jnp.zeros((1, d_model), jnp.float32),
    }
    return params, ks[6]


if __name__ == "__main__":
    B, T, S = 2, 8, 8
    key = jax.random.PRNGKey(0)
    params, key = init_params(key, N_LAYERS, D_MODEL, D_FF)
    packed = pack_params(params, N_HEADS)                 # one-time host-side packing

    key, kx, km = jax.random.split(key, 3)
    x = jax.random.normal(kx, (B, T, D_MODEL), jnp.float32)
    memory = jax.random.normal(km, (B, S, D_MODEL), jnp.float32)

    tgt_mask = jnp.tril(jnp.ones((T, T), jnp.float32))        # causal self-attn mask
    src_mask = jnp.ones((B, 1, S), jnp.float32)
    src_mask = src_mask.at[1, 0, S - 2:].set(0.0)             # some source padding

    out = decoder_forward(x, memory, tgt_mask, src_mask, packed)
    out = jax.block_until_ready(out)

    ref = decoder_reference(x, memory, tgt_mask, src_mask, params, N_HEADS)
    assert out.shape == (B, T, D_MODEL)
    # exact reciprocals everywhere -> tight f32 tolerance
    assert jnp.allclose(out, ref, atol=2e-4, rtol=2e-4), float(jnp.max(jnp.abs(out - ref)))
    print("KERNEL_OK")
</pallas_src>

<mosaic_0001>
module attributes {stable_mosaic.version = 11 : i64} {
  func.func @decoder_kernel(%arg0: i32, %arg1: i32, %arg2: memref<1x16x32xf32, #tpu.memory_space<vmem>>, %arg3: memref<1x16x32xf32, #tpu.memory_space<vmem>>, %arg4: memref<1x16x16xf32, #tpu.memory_space<vmem>>, %arg5: memref<1x16x16xf32, #tpu.memory_space<vmem>>, %arg6: memref<1x32x96xf32, #tpu.memory_space<vmem>>, %arg7: memref<1x1x96xf32, #tpu.memory_space<vmem>>, %arg8: memref<1x32x32xf32, #tpu.memory_space<vmem>>, %arg9: memref<1x1x32xf32, #tpu.memory_space<vmem>>, %arg10: memref<1x32x64xf32, #tpu.memory_space<vmem>>, %arg11: memref<1x1x64xf32, #tpu.memory_space<vmem>>, %arg12: memref<1x2x32x32xf32, #tpu.memory_space<vmem>>, %arg13: memref<1x2x1x32xf32, #tpu.memory_space<vmem>>, %arg14: memref<1x6x1x32xf32, #tpu.memory_space<vmem>>, %arg15: memref<1x32x64xf32, #tpu.memory_space<vmem>>, %arg16: memref<1x1x64xf32, #tpu.memory_space<vmem>>, %arg17: memref<1x64x32xf32, #tpu.memory_space<vmem>>, %arg18: memref<1x1x32xf32, #tpu.memory_space<vmem>>, %arg19: memref<1x32xf32, #tpu.memory_space<vmem>>, %arg20: memref<1x32xf32, #tpu.memory_space<vmem>>, %arg21: memref<1x16x32xf32, #tpu.memory_space<vmem>>, %arg22: memref<16x32xf32, #tpu.memory_space<vmem>>) attributes {dimension_semantics = [#tpu.dimension_semantics<parallel>, #tpu.dimension_semantics<arbitrary>], iteration_bounds = array<i64: 1, 2>, scalar_prefetch = 0 : i64, scratch_operands = 1 : i64, tpu.core_type = #tpu.core_type<tc>, window_params = [{transform_indices = @transform_0, window_bounds = array<i64: 1, 16, 32>}, {transform_indices = @transform_1, window_bounds = array<i64: 1, 16, 32>}, {transform_indices = @transform_2, window_bounds = array<i64: 1, 16, 16>}, {transform_indices = @transform_3, window_bounds = array<i64: 1, 16, 16>}, {transform_indices = @transform_4, window_bounds = array<i64: 1, 32, 96>}, {transform_indices = @transform_5, window_bounds = array<i64: 1, 1, 96>}, {transform_indices = @transform_6, window_bounds = array<i64: 1, 32, 32>}, {transform_indices = @transform_7, window_bounds = array<i64: 1, 1, 32>}, {transform_indices = @transform_8, window_bounds = array<i64: 1, 32, 64>}, {transform_indices = @transform_9, window_bounds = array<i64: 1, 1, 64>}, {transform_indices = @transform_10, window_bounds = array<i64: 1, 2, 32, 32>}, {transform_indices = @transform_11, window_bounds = array<i64: 1, 2, 1, 32>}, {transform_indices = @transform_12, window_bounds = array<i64: 1, 6, 1, 32>}, {transform_indices = @transform_13, window_bounds = array<i64: 1, 32, 64>}, {transform_indices = @transform_14, window_bounds = array<i64: 1, 1, 64>}, {transform_indices = @transform_15, window_bounds = array<i64: 1, 64, 32>}, {transform_indices = @transform_16, window_bounds = array<i64: 1, 1, 32>}, {pipeline_mode = #tpu.pipeline_mode<synchronous>, transform_indices = @transform_17, window_bounds = array<i64: 1, 32>}, {pipeline_mode = #tpu.pipeline_mode<synchronous>, transform_indices = @transform_18, window_bounds = array<i64: 1, 32>}, {transform_indices = @transform_19, window_bounds = array<i64: 1, 16, 32>}]} {
    %c0_i32 = arith.constant 0 : i32
    %0 = arith.cmpi eq, %arg1, %c0_i32 : i32
    %1 = arith.extui %0 : i1 to i32
    %c0_i32_0 = arith.constant 0 : i32
    %2 = arith.cmpi ne, %1, %c0_i32_0 : i32
    scf.if %2 {
      %c0_133 = arith.constant 0 : index
      %c0_134 = arith.constant 0 : index
      %c0_135 = arith.constant 0 : index
      %278 = vector.load %arg2[%c0_133, %c0_134, %c0_135] : memref<1x16x32xf32, #tpu.memory_space<vmem>>, vector<1x16x32xf32>
      %279 = vector.shape_cast %278 : vector<1x16x32xf32> to vector<16x32xf32>
      %c0_136 = arith.constant 0 : index
      %c0_137 = arith.constant 0 : index
      %280 = vector.load %arg22[%c0_136, %c0_137] : memref<16x32xf32, #tpu.memory_space<vmem>>, vector<16x32xf32>
      tpu.vector_store %arg22[%c0_136, %c0_137], %279 {strides = array<i32>} : memref<16x32xf32, #tpu.memory_space<vmem>>, vector<16x32xf32>,
    } else {
    }
    %c0 = arith.constant 0 : index
    %c0_1 = arith.constant 0 : index
    %3 = vector.load %arg22[%c0, %c0_1] : memref<16x32xf32, #tpu.memory_space<vmem>>, vector<16x32xf32>
    %c0_2 = arith.constant 0 : index
    %c0_3 = arith.constant 0 : index
    %c0_4 = arith.constant 0 : index
    %4 = vector.load %arg3[%c0_2, %c0_3, %c0_4] : memref<1x16x32xf32, #tpu.memory_space<vmem>>, vector<1x16x32xf32>
    %5 = vector.shape_cast %4 : vector<1x16x32xf32> to vector<16x32xf32>
    %c0_5 = arith.constant 0 : index
    %c0_6 = arith.constant 0 : index
    %c0_7 = arith.constant 0 : index
    %6 = vector.load %arg4[%c0_5, %c0_6, %c0_7] : memref<1x16x16xf32, #tpu.memory_space<vmem>>, vector<1x16x16xf32>
    %7 = vector.shape_cast %6 : vector<1x16x16xf32> to vector<16x16xf32>
    %c0_8 = arith.constant 0 : index
    %c0_9 = arith.constant 0 : index
    %c0_10 = arith.constant 0 : index
    %8 = vector.load %arg5[%c0_8, %c0_9, %c0_10] : memref<1x16x16xf32, #tpu.memory_space<vmem>>, vector<1x16x16xf32>
    %9 = vector.shape_cast %8 : vector<1x16x16xf32> to vector<16x16xf32>
    %c0_11 = arith.constant 0 : index
    %c0_12 = arith.constant 0 : index
    %c0_13 = arith.constant 0 : index
    %c0_14 = arith.constant 0 : index
    %10 = vector.load %arg14[%c0_11, %c0_12, %c0_13, %c0_14] : memref<1x6x1x32xf32, #tpu.memory_space<vmem>>, vector<1x1x1x32xf32>
    %11 = vector.shape_cast %10 : vector<1x1x1x32xf32> to vector<1x32xf32>
    %c0_15 = arith.constant 0 : index
    %c1 = arith.constant 1 : index
    %c0_16 = arith.constant 0 : index
    %c0_17 = arith.constant 0 : index
    %12 = vector.load %arg14[%c0_15, %c1, %c0_16, %c0_17] : memref<1x6x1x32xf32, #tpu.memory_space<vmem>>, vector<1x1x1x32xf32>
    %13 = vector.shape_cast %12 : vector<1x1x1x32xf32> to vector<1x32xf32>
    %cst = arith.constant dense<0.000000e+00> : vector<16xf32>
    %14 = vector.multi_reduction <add>, %3, %cst [1] : vector<16x32xf32> to vector<16xf32>
    %15 = vector.shape_cast %14 : vector<16xf32> to vector<16x1xf32>
    %cst_18 = arith.constant 3.200000e+01 : f32
    %16 = vector.broadcast %cst_18 : f32 to vector<16x1xf32>
    %17 = arith.divf %15, %16 : vector<16x1xf32>
    %18 = vector.broadcast %17 : vector<16x1xf32> to vector<16x32xf32>
    %19 = arith.subf %3, %18 : vector<16x32xf32>
    %20 = arith.mulf %19, %19 : vector<16x32xf32>
    %cst_19 = arith.constant dense<0.000000e+00> : vector<16xf32>
    %21 = vector.multi_reduction <add>, %20, %cst_19 [1] : vector<16x32xf32> to vector<16xf32>
    %22 = vector.shape_cast %21 : vector<16xf32> to vector<16x1xf32>
    %cst_20 = arith.constant 0.0322580636 : f32
    %23 = vector.broadcast %cst_20 : f32 to vector<16x1xf32>
    %24 = arith.mulf %22, %23 : vector<16x1xf32>
    %25 = math.sqrt %24 : vector<16x1xf32>
    %cst_21 = arith.constant 9.99999997E-7 : f32
    %26 = vector.broadcast %cst_21 : f32 to vector<16x1xf32>
    %27 = arith.addf %25, %26 : vector<16x1xf32>
    %28 = tpu.reciprocal %27 : vector<16x1xf32> -> vector<16x1xf32>
    %29 = vector.broadcast %28 : vector<16x1xf32> to vector<16x32xf32>
    %30 = arith.mulf %19, %29 : vector<16x32xf32>
    %31 = vector.broadcast %11 : vector<1x32xf32> to vector<16x32xf32>
    %32 = arith.mulf %31, %30 : vector<16x32xf32>
    %33 = vector.broadcast %13 : vector<1x32xf32> to vector<16x32xf32>
    %34 = arith.addf %32, %33 : vector<16x32xf32>
    %c0_22 = arith.constant 0 : index
    %c0_23 = arith.constant 0 : index
    %c0_24 = arith.constant 0 : index
    %35 = vector.load %arg6[%c0_22, %c0_23, %c0_24] : memref<1x32x96xf32, #tpu.memory_space<vmem>>, vector<1x32x96xf32>
    %36 = vector.shape_cast %35 : vector<1x32x96xf32> to vector<32x96xf32>
    %cst_25 = arith.constant dense<0.000000e+00> : vector<16x96xf32>
    %37 = tpu.matmul %34, %36, %cst_25 {dimension_numbers = #tpu.dot_dimension_numbers<[1], [0], [0], [1], [0, 0, 1, 1], [], []>} : vector<16x32xf32>, vector<32x96xf32>, vector<16x96xf32> -> vector<16x96xf32>
    %c0_26 = arith.constant 0 : index
    %c0_27 = arith.constant 0 : index
    %c0_28 = arith.constant 0 : index
    %38 = vector.load %arg7[%c0_26, %c0_27, %c0_28] : memref<1x1x96xf32, #tpu.memory_space<vmem>>, vector<1x1x96xf32>
    %39 = vector.shape_cast %38 : vector<1x1x96xf32> to vector<1x96xf32>
    %40 = vector.broadcast %39 : vector<1x96xf32> to vector<16x96xf32>
    %41 = arith.addf %37, %40 : vector<16x96xf32>
    %42 = vector.extract_strided_slice %41 {offsets = [0, 0], sizes = [16, 32], strides = [1, 1]} : vector<16x96xf32> to vector<16x32xf32>
    %43 = vector.extract_strided_slice %41 {offsets = [0, 32], sizes = [16, 32], strides = [1, 1]} : vector<16x96xf32> to vector<16x32xf32>
    %44 = vector.extract_strided_slice %41 {offsets = [0, 64], sizes = [16, 32], strides = [1, 1]} : vector<16x96xf32> to vector<16x32xf32>
    %c0_29 = arith.constant 0 : index
    %c0_30 = arith.constant 0 : index
    %c0_31 = arith.constant 0 : index
    %c0_32 = arith.constant 0 : index
    %45 = vector.load %arg12[%c0_29, %c0_30, %c0_31, %c0_32] : memref<1x2x32x32xf32, #tpu.memory_space<vmem>>, vector<1x1x32x32xf32>
    %46 = vector.shape_cast %45 : vector<1x1x32x32xf32> to vector<32x32xf32>
    %c0_33 = arith.constant 0 : index
    %c0_34 = arith.constant 0 : index
    %c0_35 = arith.constant 0 : index
    %c0_36 = arith.constant 0 : index
    %47 = vector.load %arg13[%c0_33, %c0_34, %c0_35, %c0_36] : memref<1x2x1x32xf32, #tpu.memory_space<vmem>>, vector<1x1x1x32xf32>
    %48 = vector.shape_cast %47 : vector<1x1x1x32xf32> to vector<1x32xf32>
    %49 = vector.extract_strided_slice %42 {offsets = [0, 0], sizes = [16, 8], strides = [1, 1]} : vector<16x32xf32> to vector<16x8xf32>
    %50 = vector.extract_strided_slice %43 {offsets = [0, 0], sizes = [16, 8], strides = [1, 1]} : vector<16x32xf32> to vector<16x8xf32>
    %cst_37 = arith.constant dense<0.000000e+00> : vector<16x16xf32>
    %51 = tpu.matmul %49, %50, %cst_37 {dimension_numbers = #tpu.dot_dimension_numbers<[1], [1], [0], [0], [0, 0, 1, 0], [], []>} : vector<16x8xf32>, vector<16x8xf32>, vector<16x16xf32> -> vector<16x16xf32>
    %52 = arith.addf %51, %7 : vector<16x16xf32>
    %cst_38 = arith.constant dense<0xFF800000> : vector<16xf32>
    %53 = vector.multi_reduction <maximumf>, %52, %cst_38 [1] : vector<16x16xf32> to vector<16xf32>
    %54 = vector.shape_cast %53 : vector<16xf32> to vector<16x1xf32>
    %55 = vector.broadcast %54 : vector<16x1xf32> to vector<16x16xf32>
    %56 = arith.subf %52, %55 : vector<16x16xf32>
    %57 = math.exp %56 : vector<16x16xf32>
    %cst_39 = arith.constant dense<0.000000e+00> : vector<16xf32>
    %58 = vector.multi_reduction <add>, %57, %cst_39 [1] : vector<16x16xf32> to vector<16xf32>
    %59 = vector.shape_cast %58 : vector<16xf32> to vector<16x1xf32>
    %60 = tpu.reciprocal %59 : vector<16x1xf32> -> vector<16x1xf32>
    %61 = vector.broadcast %60 : vector<16x1xf32> to vector<16x16xf32>
    %62 = arith.mulf %57, %61 : vector<16x16xf32>
    %63 = vector.extract_strided_slice %44 {offsets = [0, 0], sizes = [16, 8], strides = [1, 1]} : vector<16x32xf32> to vector<16x8xf32>
    %cst_40 = arith.constant dense<0.000000e+00> : vector<16x8xf32>
    %64 = tpu.matmul %62, %63, %cst_40 {dimension_numbers = #tpu.dot_dimension_numbers<[1], [0], [0], [1], [0, 0, 1, 1], [], []>} : vector<16x16xf32>, vector<16x8xf32>, vector<16x8xf32> -> vector<16x8xf32>
    %65 = vector.extract_strided_slice %42 {offsets = [0, 8], sizes = [16, 8], strides = [1, 1]} : vector<16x32xf32> to vector<16x8xf32>
    %66 = vector.extract_strided_slice %43 {offsets = [0, 8], sizes = [16, 8], strides = [1, 1]} : vector<16x32xf32> to vector<16x8xf32>
    %cst_41 = arith.constant dense<0.000000e+00> : vector<16x16xf32>
    %67 = tpu.matmul %65, %66, %cst_41 {dimension_numbers = #tpu.dot_dimension_numbers<[1], [1], [0], [0], [0, 0, 1, 0], [], []>} : vector<16x8xf32>, vector<16x8xf32>, vector<16x16xf32> -> vector<16x16xf32>
    %68 = arith.addf %67, %7 : vector<16x16xf32>
    %cst_42 = arith.constant dense<0xFF800000> : vector<16xf32>
    %69 = vector.multi_reduction <maximumf>, %68, %cst_42 [1] : vector<16x16xf32> to vector<16xf32>
    %70 = vector.shape_cast %69 : vector<16xf32> to vector<16x1xf32>
    %71 = vector.broadcast %70 : vector<16x1xf32> to vector<16x16xf32>
    %72 = arith.subf %68, %71 : vector<16x16xf32>
    %73 = math.exp %72 : vector<16x16xf32>
    %cst_43 = arith.constant dense<0.000000e+00> : vector<16xf32>
    %74 = vector.multi_reduction <add>, %73, %cst_43 [1] : vector<16x16xf32> to vector<16xf32>
    %75 = vector.shape_cast %74 : vector<16xf32> to vector<16x1xf32>
    %76 = tpu.reciprocal %75 : vector<16x1xf32> -> vector<16x1xf32>
    %77 = vector.broadcast %76 : vector<16x1xf32> to vector<16x16xf32>
    %78 = arith.mulf %73, %77 : vector<16x16xf32>
    %79 = vector.extract_strided_slice %44 {offsets = [0, 8], sizes = [16, 8], strides = [1, 1]} : vector<16x32xf32> to vector<16x8xf32>
    %cst_44 = arith.constant dense<0.000000e+00> : vector<16x8xf32>
    %80 = tpu.matmul %78, %79, %cst_44 {dimension_numbers = #tpu.dot_dimension_numbers<[1], [0], [0], [1], [0, 0, 1, 1], [], []>} : vector<16x16xf32>, vector<16x8xf32>, vector<16x8xf32> -> vector<16x8xf32>
    %81 = vector.extract_strided_slice %42 {offsets = [0, 16], sizes = [16, 8], strides = [1, 1]} : vector<16x32xf32> to vector<16x8xf32>
    %82 = vector.extract_strided_slice %43 {offsets = [0, 16], sizes = [16, 8], strides = [1, 1]} : vector<16x32xf32> to vector<16x8xf32>
    %cst_45 = arith.constant dense<0.000000e+00> : vector<16x16xf32>
    %83 = tpu.matmul %81, %82, %cst_45 {dimension_numbers = #tpu.dot_dimension_numbers<[1], [1], [0], [0], [0, 0, 1, 0], [], []>} : vector<16x8xf32>, vector<16x8xf32>, vector<16x16xf32> -> vector<16x16xf32>
    %84 = arith.addf %83, %7 : vector<16x16xf32>
    %cst_46 = arith.constant dense<0xFF800000> : vector<16xf32>
    %85 = vector.multi_reduction <maximumf>, %84, %cst_46 [1] : vector<16x16xf32> to vector<16xf32>
    %86 = vector.shape_cast %85 : vector<16xf32> to vector<16x1xf32>
    %87 = vector.broadcast %86 : vector<16x1xf32> to vector<16x16xf32>
    %88 = arith.subf %84, %87 : vector<16x16xf32>
    %89 = math.exp %88 : vector<16x16xf32>
    %cst_47 = arith.constant dense<0.000000e+00> : vector<16xf32>
    %90 = vector.multi_reduction <add>, %89, %cst_47 [1] : vector<16x16xf32> to vector<16xf32>
    %91 = vector.shape_cast %90 : vector<16xf32> to vector<16x1xf32>
    %92 = tpu.reciprocal %91 : vector<16x1xf32> -> vector<16x1xf32>
    %93 = vector.broadcast %92 : vector<16x1xf32> to vector<16x16xf32>
    %94 = arith.mulf %89, %93 : vector<16x16xf32>
    %95 = vector.extract_strided_slice %44 {offsets = [0, 16], sizes = [16, 8], strides = [1, 1]} : vector<16x32xf32> to vector<16x8xf32>
    %cst_48 = arith.constant dense<0.000000e+00> : vector<16x8xf32>
    %96 = tpu.matmul %94, %95, %cst_48 {dimension_numbers = #tpu.dot_dimension_numbers<[1], [0], [0], [1], [0, 0, 1, 1], [], []>} : vector<16x16xf32>, vector<16x8xf32>, vector<16x8xf32> -> vector<16x8xf32>
    %97 = vector.extract_strided_slice %42 {offsets = [0, 24], sizes = [16, 8], strides = [1, 1]} : vector<16x32xf32> to vector<16x8xf32>
    %98 = vector.extract_strided_slice %43 {offsets = [0, 24], sizes = [16, 8], strides = [1, 1]} : vector<16x32xf32> to vector<16x8xf32>
    %cst_49 = arith.constant dense<0.000000e+00> : vector<16x16xf32>
    %99 = tpu.matmul %97, %98, %cst_49 {dimension_numbers = #tpu.dot_dimension_numbers<[1], [1], [0], [0], [0, 0, 1, 0], [], []>} : vector<16x8xf32>, vector<16x8xf32>, vector<16x16xf32> -> vector<16x16xf32>
    %100 = arith.addf %99, %7 : vector<16x16xf32>
    %cst_50 = arith.constant dense<0xFF800000> : vector<16xf32>
    %101 = vector.multi_reduction <maximumf>, %100, %cst_50 [1] : vector<16x16xf32> to vector<16xf32>
    %102 = vector.shape_cast %101 : vector<16xf32> to vector<16x1xf32>
    %103 = vector.broadcast %102 : vector<16x1xf32> to vector<16x16xf32>
    %104 = arith.subf %100, %103 : vector<16x16xf32>
    %105 = math.exp %104 : vector<16x16xf32>
    %cst_51 = arith.constant dense<0.000000e+00> : vector<16xf32>
    %106 = vector.multi_reduction <add>, %105, %cst_51 [1] : vector<16x16xf32> to vector<16xf32>
    %107 = vector.shape_cast %106 : vector<16xf32> to vector<16x1xf32>
    %108 = tpu.reciprocal %107 : vector<16x1xf32> -> vector<16x1xf32>
    %109 = vector.broadcast %108 : vector<16x1xf32> to vector<16x16xf32>
    %110 = arith.mulf %105, %109 : vector<16x16xf32>
    %111 = vector.extract_strided_slice %44 {offsets = [0, 24], sizes = [16, 8], strides = [1, 1]} : vector<16x32xf32> to vector<16x8xf32>
    %cst_52 = arith.constant dense<0.000000e+00> : vector<16x8xf32>
    %112 = tpu.matmul %110, %111, %cst_52 {dimension_numbers = #tpu.dot_dimension_numbers<[1], [0], [0], [1], [0, 0, 1, 1], [], []>} : vector<16x16xf32>, vector<16x8xf32>, vector<16x8xf32> -> vector<16x8xf32>
    %113 = tpu.concatenate %64, %80, %96, %112 in 1 : vector<16x8xf32>, vector<16x8xf32>, vector<16x8xf32>, vector<16x8xf32> -> vector<16x32xf32>
    %cst_53 = arith.constant dense<0.000000e+00> : vector<16x32xf32>
    %114 = tpu.matmul %113, %46, %cst_53 {dimension_numbers = #tpu.dot_dimension_numbers<[1], [0], [0], [1], [0, 0, 1, 1], [], []>} : vector<16x32xf32>, vector<32x32xf32>, vector<16x32xf32> -> vector<16x32xf32>
    %115 = vector.broadcast %48 : vector<1x32xf32> to vector<16x32xf32>
    %116 = arith.addf %114, %115 : vector<16x32xf32>
    %117 = arith.addf %3, %116 : vector<16x32xf32>
    %c0_54 = arith.constant 0 : index
    %c2 = arith.constant 2 : index
    %c0_55 = arith.constant 0 : index
    %c0_56 = arith.constant 0 : index
    %118 = vector.load %arg14[%c0_54, %c2, %c0_55, %c0_56] : memref<1x6x1x32xf32, #tpu.memory_space<vmem>>, vector<1x1x1x32xf32>
    %119 = vector.shape_cast %118 : vector<1x1x1x32xf32> to vector<1x32xf32>
    %c0_57 = arith.constant 0 : index
    %c3 = arith.constant 3 : index
    %c0_58 = arith.constant 0 : index
    %c0_59 = arith.constant 0 : index
    %120 = vector.load %arg14[%c0_57, %c3, %c0_58, %c0_59] : memref<1x6x1x32xf32, #tpu.memory_space<vmem>>, vector<1x1x1x32xf32>
    %121 = vector.shape_cast %120 : vector<1x1x1x32xf32> to vector<1x32xf32>
    %cst_60 = arith.constant dense<0.000000e+00> : vector<16xf32>
    %122 = vector.multi_reduction <add>, %117, %cst_60 [1] : vector<16x32xf32> to vector<16xf32>
    %123 = vector.shape_cast %122 : vector<16xf32> to vector<16x1xf32>
    %cst_61 = arith.constant 3.200000e+01 : f32
    %124 = vector.broadcast %cst_61 : f32 to vector<16x1xf32>
    %125 = arith.divf %123, %124 : vector<16x1xf32>
    %126 = vector.broadcast %125 : vector<16x1xf32> to vector<16x32xf32>
    %127 = arith.subf %117, %126 : vector<16x32xf32>
    %128 = arith.mulf %127, %127 : vector<16x32xf32>
    %cst_62 = arith.constant dense<0.000000e+00> : vector<16xf32>
    %129 = vector.multi_reduction <add>, %128, %cst_62 [1] : vector<16x32xf32> to vector<16xf32>
    %130 = vector.shape_cast %129 : vector<16xf32> to vector<16x1xf32>
    %cst_63 = arith.constant 0.0322580636 : f32
    %131 = vector.broadcast %cst_63 : f32 to vector<16x1xf32>
    %132 = arith.mulf %130, %131 : vector<16x1xf32>
    %133 = math.sqrt %132 : vector<16x1xf32>
    %cst_64 = arith.constant 9.99999997E-7 : f32
    %134 = vector.broadcast %cst_64 : f32 to vector<16x1xf32>
    %135 = arith.addf %133, %134 : vector<16x1xf32>
    %136 = tpu.reciprocal %135 : vector<16x1xf32> -> vector<16x1xf32>
    %137 = vector.broadcast %136 : vector<16x1xf32> to vector<16x32xf32>
    %138 = arith.mulf %127, %137 : vector<16x32xf32>
    %139 = vector.broadcast %119 : vector<1x32xf32> to vector<16x32xf32>
    %140 = arith.mulf %139, %138 : vector<16x32xf32>
    %141 = vector.broadcast %121 : vector<1x32xf32> to vector<16x32xf32>
    %142 = arith.addf %140, %141 : vector<16x32xf32>
    %c0_65 = arith.constant 0 : index
    %c0_66 = arith.constant 0 : index
    %c0_67 = arith.constant 0 : index
    %143 = vector.load %arg8[%c0_65, %c0_66, %c0_67] : memref<1x32x32xf32, #tpu.memory_space<vmem>>, vector<1x32x32xf32>
    %144 = vector.shape_cast %143 : vector<1x32x32xf32> to vector<32x32xf32>
    %cst_68 = arith.constant dense<0.000000e+00> : vector<16x32xf32>
    %145 = tpu.matmul %142, %144, %cst_68 {dimension_numbers = #tpu.dot_dimension_numbers<[1], [0], [0], [1], [0, 0, 1, 1], [], []>} : vector<16x32xf32>, vector<32x32xf32>, vector<16x32xf32> -> vector<16x32xf32>
    %c0_69 = arith.constant 0 : index
    %c0_70 = arith.constant 0 : index
    %c0_71 = arith.constant 0 : index
    %146 = vector.load %arg9[%c0_69, %c0_70, %c0_71] : memref<1x1x32xf32, #tpu.memory_space<vmem>>, vector<1x1x32xf32>
    %147 = vector.shape_cast %146 : vector<1x1x32xf32> to vector<1x32xf32>
    %148 = vector.broadcast %147 : vector<1x32xf32> to vector<16x32xf32>
    %149 = arith.addf %145, %148 : vector<16x32xf32>
    %c0_72 = arith.constant 0 : index
    %c0_73 = arith.constant 0 : index
    %c0_74 = arith.constant 0 : index
    %150 = vector.load %arg10[%c0_72, %c0_73, %c0_74] : memref<1x32x64xf32, #tpu.memory_space<vmem>>, vector<1x32x64xf32>
    %151 = vector.shape_cast %150 : vector<1x32x64xf32> to vector<32x64xf32>
    %cst_75 = arith.constant dense<0.000000e+00> : vector<16x64xf32>
    %152 = tpu.matmul %5, %151, %cst_75 {dimension_numbers = #tpu.dot_dimension_numbers<[1], [0], [0], [1], [0, 0, 1, 1], [], []>} : vector<16x32xf32>, vector<32x64xf32>, vector<16x64xf32> -> vector<16x64xf32>
    %c0_76 = arith.constant 0 : index
    %c0_77 = arith.constant 0 : index
    %c0_78 = arith.constant 0 : index
    %153 = vector.load %arg11[%c0_76, %c0_77, %c0_78] : memref<1x1x64xf32, #tpu.memory_space<vmem>>, vector<1x1x64xf32>
    %154 = vector.shape_cast %153 : vector<1x1x64xf32> to vector<1x64xf32>
    %155 = vector.broadcast %154 : vector<1x64xf32> to vector<16x64xf32>
    %156 = arith.addf %152, %155 : vector<16x64xf32>
    %157 = vector.extract_strided_slice %156 {offsets = [0, 0], sizes = [16, 32], strides = [1, 1]} : vector<16x64xf32> to vector<16x32xf32>
    %158 = vector.extract_strided_slice %156 {offsets = [0, 32], sizes = [16, 32], strides = [1, 1]} : vector<16x64xf32> to vector<16x32xf32>
    %c0_79 = arith.constant 0 : index
    %c1_80 = arith.constant 1 : index
    %c0_81 = arith.constant 0 : index
    %c0_82 = arith.constant 0 : index
    %159 = vector.load %arg12[%c0_79, %c1_80, %c0_81, %c0_82] : memref<1x2x32x32xf32, #tpu.memory_space<vmem>>, vector<1x1x32x32xf32>
    %160 = vector.shape_cast %159 : vector<1x1x32x32xf32> to vector<32x32xf32>
    %c0_83 = arith.constant 0 : index
    %c1_84 = arith.constant 1 : index
    %c0_85 = arith.constant 0 : index
    %c0_86 = arith.constant 0 : index
    %161 = vector.load %arg13[%c0_83, %c1_84, %c0_85, %c0_86] : memref<1x2x1x32xf32, #tpu.memory_space<vmem>>, vector<1x1x1x32xf32>
    %162 = vector.shape_cast %161 : vector<1x1x1x32xf32> to vector<1x32xf32>
    %163 = vector.extract_strided_slice %149 {offsets = [0, 0], sizes = [16, 8], strides = [1, 1]} : vector<16x32xf32> to vector<16x8xf32>
    %164 = vector.extract_strided_slice %157 {offsets = [0, 0], sizes = [16, 8], strides = [1, 1]} : vector<16x32xf32> to vector<16x8xf32>
    %cst_87 = arith.constant dense<0.000000e+00> : vector<16x16xf32>
    %165 = tpu.matmul %163, %164, %cst_87 {dimension_numbers = #tpu.dot_dimension_numbers<[1], [1], [0], [0], [0, 0, 1, 0], [], []>} : vector<16x8xf32>, vector<16x8xf32>, vector<16x16xf32> -> vector<16x16xf32>
    %166 = arith.addf %165, %9 : vector<16x16xf32>
    %cst_88 = arith.constant dense<0xFF800000> : vector<16xf32>
    %167 = vector.multi_reduction <maximumf>, %166, %cst_88 [1] : vector<16x16xf32> to vector<16xf32>
    %168 = vector.shape_cast %167 : vector<16xf32> to vector<16x1xf32>
    %169 = vector.broadcast %168 : vector<16x1xf32> to vector<16x16xf32>
    %170 = arith.subf %166, %169 : vector<16x16xf32>
    %171 = math.exp %170 : vector<16x16xf32>
    %cst_89 = arith.constant dense<0.000000e+00> : vector<16xf32>
    %172 = vector.multi_reduction <add>, %171, %cst_89 [1] : vector<16x16xf32> to vector<16xf32>
    %173 = vector.shape_cast %172 : vector<16xf32> to vector<16x1xf32>
    %174 = tpu.reciprocal %173 : vector<16x1xf32> -> vector<16x1xf32>
    %175 = vector.broadcast %174 : vector<16x1xf32> to vector<16x16xf32>
    %176 = arith.mulf %171, %175 : vector<16x16xf32>
    %177 = vector.extract_strided_slice %158 {offsets = [0, 0], sizes = [16, 8], strides = [1, 1]} : vector<16x32xf32> to vector<16x8xf32>
    %cst_90 = arith.constant dense<0.000000e+00> : vector<16x8xf32>
    %178 = tpu.matmul %176, %177, %cst_90 {dimension_numbers = #tpu.dot_dimension_numbers<[1], [0], [0], [1], [0, 0, 1, 1], [], []>} : vector<16x16xf32>, vector<16x8xf32>, vector<16x8xf32> -> vector<16x8xf32>
    %179 = vector.extract_strided_slice %149 {offsets = [0, 8], sizes = [16, 8], strides = [1, 1]} : vector<16x32xf32> to vector<16x8xf32>
    %180 = vector.extract_strided_slice %157 {offsets = [0, 8], sizes = [16, 8], strides = [1, 1]} : vector<16x32xf32> to vector<16x8xf32>
    %cst_91 = arith.constant dense<0.000000e+00> : vector<16x16xf32>
    %181 = tpu.matmul %179, %180, %cst_91 {dimension_numbers = #tpu.dot_dimension_numbers<[1], [1], [0], [0], [0, 0, 1, 0], [], []>} : vector<16x8xf32>, vector<16x8xf32>, vector<16x16xf32> -> vector<16x16xf32>
    %182 = arith.addf %181, %9 : vector<16x16xf32>
    %cst_92 = arith.constant dense<0xFF800000> : vector<16xf32>
    %183 = vector.multi_reduction <maximumf>, %182, %cst_92 [1] : vector<16x16xf32> to vector<16xf32>
    %184 = vector.shape_cast %183 : vector<16xf32> to vector<16x1xf32>
    %185 = vector.broadcast %184 : vector<16x1xf32> to vector<16x16xf32>
    %186 = arith.subf %182, %185 : vector<16x16xf32>
    %187 = math.exp %186 : vector<16x16xf32>
    %cst_93 = arith.constant dense<0.000000e+00> : vector<16xf32>
    %188 = vector.multi_reduction <add>, %187, %cst_93 [1] : vector<16x16xf32> to vector<16xf32>
    %189 = vector.shape_cast %188 : vector<16xf32> to vector<16x1xf32>
    %190 = tpu.reciprocal %189 : vector<16x1xf32> -> vector<16x1xf32>
    %191 = vector.broadcast %190 : vector<16x1xf32> to vector<16x16xf32>
    %192 = arith.mulf %187, %191 : vector<16x16xf32>
    %193 = vector.extract_strided_slice %158 {offsets = [0, 8], sizes = [16, 8], strides = [1, 1]} : vector<16x32xf32> to vector<16x8xf32>
    %cst_94 = arith.constant dense<0.000000e+00> : vector<16x8xf32>
    %194 = tpu.matmul %192, %193, %cst_94 {dimension_numbers = #tpu.dot_dimension_numbers<[1], [0], [0], [1], [0, 0, 1, 1], [], []>} : vector<16x16xf32>, vector<16x8xf32>, vector<16x8xf32> -> vector<16x8xf32>
    %195 = vector.extract_strided_slice %149 {offsets = [0, 16], sizes = [16, 8], strides = [1, 1]} : vector<16x32xf32> to vector<16x8xf32>
    %196 = vector.extract_strided_slice %157 {offsets = [0, 16], sizes = [16, 8], strides = [1, 1]} : vector<16x32xf32> to vector<16x8xf32>
    %cst_95 = arith.constant dense<0.000000e+00> : vector<16x16xf32>
    %197 = tpu.matmul %195, %196, %cst_95 {dimension_numbers = #tpu.dot_dimension_numbers<[1], [1], [0], [0], [0, 0, 1, 0], [], []>} : vector<16x8xf32>, vector<16x8xf32>, vector<16x16xf32> -> vector<16x16xf32>
    %198 = arith.addf %197, %9 : vector<16x16xf32>
    %cst_96 = arith.constant dense<0xFF800000> : vector<16xf32>
    %199 = vector.multi_reduction <maximumf>, %198, %cst_96 [1] : vector<16x16xf32> to vector<16xf32>
    %200 = vector.shape_cast %199 : vector<16xf32> to vector<16x1xf32>
    %201 = vector.broadcast %200 : vector<16x1xf32> to vector<16x16xf32>
    %202 = arith.subf %198, %201 : vector<16x16xf32>
    %203 = math.exp %202 : vector<16x16xf32>
    %cst_97 = arith.constant dense<0.000000e+00> : vector<16xf32>
    %204 = vector.multi_reduction <add>, %203, %cst_97 [1] : vector<16x16xf32> to vector<16xf32>
    %205 = vector.shape_cast %204 : vector<16xf32> to vector<16x1xf32>
    %206 = tpu.reciprocal %205 : vector<16x1xf32> -> vector<16x1xf32>
    %207 = vector.broadcast %206 : vector<16x1xf32> to vector<16x16xf32>
    %208 = arith.mulf %203, %207 : vector<16x16xf32>
    %209 = vector.extract_strided_slice %158 {offsets = [0, 16], sizes = [16, 8], strides = [1, 1]} : vector<16x32xf32> to vector<16x8xf32>
    %cst_98 = arith.constant dense<0.000000e+00> : vector<16x8xf32>
    %210 = tpu.matmul %208, %209, %cst_98 {dimension_numbers = #tpu.dot_dimension_numbers<[1], [0], [0], [1], [0, 0, 1, 1], [], []>} : vector<16x16xf32>, vector<16x8xf32>, vector<16x8xf32> -> vector<16x8xf32>
    %211 = vector.extract_strided_slice %149 {offsets = [0, 24], sizes = [16, 8], strides = [1, 1]} : vector<16x32xf32> to vector<16x8xf32>
    %212 = vector.extract_strided_slice %157 {offsets = [0, 24], sizes = [16, 8], strides = [1, 1]} : vector<16x32xf32> to vector<16x8xf32>
    %cst_99 = arith.constant dense<0.000000e+00> : vector<16x16xf32>
    %213 = tpu.matmul %211, %212, %cst_99 {dimension_numbers = #tpu.dot_dimension_numbers<[1], [1], [0], [0], [0, 0, 1, 0], [], []>} : vector<16x8xf32>, vector<16x8xf32>, vector<16x16xf32> -> vector<16x16xf32>
    %214 = arith.addf %213, %9 : vector<16x16xf32>
    %cst_100 = arith.constant dense<0xFF800000> : vector<16xf32>
    %215 = vector.multi_reduction <maximumf>, %214, %cst_100 [1] : vector<16x16xf32> to vector<16xf32>
    %216 = vector.shape_cast %215 : vector<16xf32> to vector<16x1xf32>
    %217 = vector.broadcast %216 : vector<16x1xf32> to vector<16x16xf32>
    %218 = arith.subf %214, %217 : vector<16x16xf32>
    %219 = math.exp %218 : vector<16x16xf32>
    %cst_101 = arith.constant dense<0.000000e+00> : vector<16xf32>
    %220 = vector.multi_reduction <add>, %219, %cst_101 [1] : vector<16x16xf32> to vector<16xf32>
    %221 = vector.shape_cast %220 : vector<16xf32> to vector<16x1xf32>
    %222 = tpu.reciprocal %221 : vector<16x1xf32> -> vector<16x1xf32>
    %223 = vector.broadcast %222 : vector<16x1xf32> to vector<16x16xf32>
    %224 = arith.mulf %219, %223 : vector<16x16xf32>
    %225 = vector.extract_strided_slice %158 {offsets = [0, 24], sizes = [16, 8], strides = [1, 1]} : vector<16x32xf32> to vector<16x8xf32>
    %cst_102 = arith.constant dense<0.000000e+00> : vector<16x8xf32>
    %226 = tpu.matmul %224, %225, %cst_102 {dimension_numbers = #tpu.dot_dimension_numbers<[1], [0], [0], [1], [0, 0, 1, 1], [], []>} : vector<16x16xf32>, vector<16x8xf32>, vector<16x8xf32> -> vector<16x8xf32>
    %227 = tpu.concatenate %178, %194, %210, %226 in 1 : vector<16x8xf32>, vector<16x8xf32>, vector<16x8xf32>, vector<16x8xf32> -> vector<16x32xf32>
    %cst_103 = arith.constant dense<0.000000e+00> : vector<16x32xf32>
    %228 = tpu.matmul %227, %160, %cst_103 {dimension_numbers = #tpu.dot_dimension_numbers<[1], [0], [0], [1], [0, 0, 1, 1], [], []>} : vector<16x32xf32>, vector<32x32xf32>, vector<16x32xf32> -> vector<16x32xf32>
    %229 = vector.broadcast %162 : vector<1x32xf32> to vector<16x32xf32>
    %230 = arith.addf %228, %229 : vector<16x32xf32>
    %231 = arith.addf %117, %230 : vector<16x32xf32>
    %c0_104 = arith.constant 0 : index
    %c4 = arith.constant 4 : index
    %c0_105 = arith.constant 0 : index
    %c0_106 = arith.constant 0 : index
    %232 = vector.load %arg14[%c0_104, %c4, %c0_105, %c0_106] : memref<1x6x1x32xf32, #tpu.memory_space<vmem>>, vector<1x1x1x32xf32>
    %233 = vector.shape_cast %232 : vector<1x1x1x32xf32> to vector<1x32xf32>
    %c0_107 = arith.constant 0 : index
    %c5 = arith.constant 5 : index
    %c0_108 = arith.constant 0 : index
    %c0_109 = arith.constant 0 : index
    %234 = vector.load %arg14[%c0_107, %c5, %c0_108, %c0_109] : memref<1x6x1x32xf32, #tpu.memory_space<vmem>>, vector<1x1x1x32xf32>
    %235 = vector.shape_cast %234 : vector<1x1x1x32xf32> to vector<1x32xf32>
    %cst_110 = arith.constant dense<0.000000e+00> : vector<16xf32>
    %236 = vector.multi_reduction <add>, %231, %cst_110 [1] : vector<16x32xf32> to vector<16xf32>
    %237 = vector.shape_cast %236 : vector<16xf32> to vector<16x1xf32>
    %cst_111 = arith.constant 3.200000e+01 : f32
    %238 = vector.broadcast %cst_111 : f32 to vector<16x1xf32>
    %239 = arith.divf %237, %238 : vector<16x1xf32>
    %240 = vector.broadcast %239 : vector<16x1xf32> to vector<16x32xf32>
    %241 = arith.subf %231, %240 : vector<16x32xf32>
    %242 = arith.mulf %241, %241 : vector<16x32xf32>
    %cst_112 = arith.constant dense<0.000000e+00> : vector<16xf32>
    %243 = vector.multi_reduction <add>, %242, %cst_112 [1] : vector<16x32xf32> to vector<16xf32>
    %244 = vector.shape_cast %243 : vector<16xf32> to vector<16x1xf32>
    %cst_113 = arith.constant 0.0322580636 : f32
    %245 = vector.broadcast %cst_113 : f32 to vector<16x1xf32>
    %246 = arith.mulf %244, %245 : vector<16x1xf32>
    %247 = math.sqrt %246 : vector<16x1xf32>
    %cst_114 = arith.constant 9.99999997E-7 : f32
    %248 = vector.broadcast %cst_114 : f32 to vector<16x1xf32>
    %249 = arith.addf %247, %248 : vector<16x1xf32>
    %250 = tpu.reciprocal %249 : vector<16x1xf32> -> vector<16x1xf32>
    %251 = vector.broadcast %250 : vector<16x1xf32> to vector<16x32xf32>
    %252 = arith.mulf %241, %251 : vector<16x32xf32>
    %253 = vector.broadcast %233 : vector<1x32xf32> to vector<16x32xf32>
    %254 = arith.mulf %253, %252 : vector<16x32xf32>
    %255 = vector.broadcast %235 : vector<1x32xf32> to vector<16x32xf32>
    %256 = arith.addf %254, %255 : vector<16x32xf32>
    %c0_115 = arith.constant 0 : index
    %c0_116 = arith.constant 0 : index
    %c0_117 = arith.constant 0 : index
    %257 = vector.load %arg15[%c0_115, %c0_116, %c0_117] : memref<1x32x64xf32, #tpu.memory_space<vmem>>, vector<1x32x64xf32>
    %258 = vector.shape_cast %257 : vector<1x32x64xf32> to vector<32x64xf32>
    %cst_118 = arith.constant dense<0.000000e+00> : vector<16x64xf32>
    %259 = tpu.matmul %256, %258, %cst_118 {dimension_numbers = #tpu.dot_dimension_numbers<[1], [0], [0], [1], [0, 0, 1, 1], [], []>} : vector<16x32xf32>, vector<32x64xf32>, vector<16x64xf32> -> vector<16x64xf32>
    %c0_119 = arith.constant 0 : index
    %c0_120 = arith.constant 0 : index
    %c0_121 = arith.constant 0 : index
    %260 = vector.load %arg16[%c0_119, %c0_120, %c0_121] : memref<1x1x64xf32, #tpu.memory_space<vmem>>, vector<1x1x64xf32>
    %261 = vector.shape_cast %260 : vector<1x1x64xf32> to vector<1x64xf32>
    %262 = vector.broadcast %261 : vector<1x64xf32> to vector<16x64xf32>
    %263 = arith.addf %259, %262 : vector<16x64xf32>
    %cst_122 = arith.constant 0.000000e+00 : f32
    %264 = vector.broadcast %cst_122 : f32 to vector<16x64xf32>
    %265 = arith.maximumf %263, %264 : vector<16x64xf32>
    %c0_123 = arith.constant 0 : index
    %c0_124 = arith.constant 0 : index
    %c0_125 = arith.constant 0 : index
    %266 = vector.load %arg17[%c0_123, %c0_124, %c0_125] : memref<1x64x32xf32, #tpu.memory_space<vmem>>, vector<1x64x32xf32>
    %267 = vector.shape_cast %266 : vector<1x64x32xf32> to vector<64x32xf32>
    %cst_126 = arith.constant dense<0.000000e+00> : vector<16x32xf32>
    %268 = tpu.matmul %265, %267, %cst_126 {dimension_numbers = #tpu.dot_dimension_numbers<[1], [0], [0], [1], [0, 0, 1, 1], [], []>} : vector<16x64xf32>, vector<64x32xf32>, vector<16x32xf32> -> vector<16x32xf32>
    %269 = arith.addf %231, %268 : vector<16x32xf32>
    %c0_127 = arith.constant 0 : index
    %c0_128 = arith.constant 0 : index
    %c0_129 = arith.constant 0 : index
    %270 = vector.load %arg18[%c0_127, %c0_128, %c0_129] : memref<1x1x32xf32, #tpu.memory_space<vmem>>, vector<1x1x32xf32>
    %271 = vector.shape_cast %270 : vector<1x1x32xf32> to vector<1x32xf32>
    %272 = vector.broadcast %271 : vector<1x32xf32> to vector<16x32xf32>
    %273 = arith.addf %269, %272 : vector<16x32xf32>
    %c0_130 = arith.constant 0 : index
    %c0_131 = arith.constant 0 : index
    %274 = vector.load %arg22[%c0_130, %c0_131] : memref<16x32xf32, #tpu.memory_space<vmem>>, vector<16x32xf32>
    tpu.vector_store %arg22[%c0_130, %c0_131], %273 {strides = array<i32>} : memref<16x32xf32, #tpu.memory_space<vmem>>, vector<16x32xf32>,
    %c1_i32 = arith.constant 1 : i32
    %275 = arith.cmpi eq, %arg1, %c1_i32 : i32
    %276 = arith.extui %275 : i1 to i32
    %c0_i32_132 = arith.constant 0 : i32
    %277 = arith.cmpi ne, %276, %c0_i32_132 : i32
    scf.if %277 {
      %c0_133 = arith.constant 0 : index
      %c0_134 = arith.constant 0 : index
      %278 = vector.load %arg19[%c0_133, %c0_134] : memref<1x32xf32, #tpu.memory_space<vmem>>, vector<1x32xf32>
      %c0_135 = arith.constant 0 : index
      %c0_136 = arith.constant 0 : index
      %279 = vector.load %arg20[%c0_135, %c0_136] : memref<1x32xf32, #tpu.memory_space<vmem>>, vector<1x32xf32>
      %cst_137 = arith.constant dense<0.000000e+00> : vector<16xf32>
      %280 = vector.multi_reduction <add>, %273, %cst_137 [1] : vector<16x32xf32> to vector<16xf32>
      %281 = vector.shape_cast %280 : vector<16xf32> to vector<16x1xf32>
      %cst_138 = arith.constant 3.200000e+01 : f32
      %282 = vector.broadcast %cst_138 : f32 to vector<16x1xf32>
      %283 = arith.divf %281, %282 : vector<16x1xf32>
      %284 = vector.broadcast %283 : vector<16x1xf32> to vector<16x32xf32>
      %285 = arith.subf %273, %284 : vector<16x32xf32>
      %286 = arith.mulf %285, %285 : vector<16x32xf32>
      %cst_139 = arith.constant dense<0.000000e+00> : vector<16xf32>
      %287 = vector.multi_reduction <add>, %286, %cst_139 [1] : vector<16x32xf32> to vector<16xf32>
      %288 = vector.shape_cast %287 : vector<16xf32> to vector<16x1xf32>
      %cst_140 = arith.constant 0.0322580636 : f32
      %289 = vector.broadcast %cst_140 : f32 to vector<16x1xf32>
      %290 = arith.mulf %288, %289 : vector<16x1xf32>
      %291 = math.sqrt %290 : vector<16x1xf32>
      %cst_141 = arith.constant 9.99999997E-7 : f32
      %292 = vector.broadcast %cst_141 : f32 to vector<16x1xf32>
      %293 = arith.addf %291, %292 : vector<16x1xf32>
      %294 = tpu.reciprocal %293 : vector<16x1xf32> -> vector<16x1xf32>
      %295 = vector.broadcast %294 : vector<16x1xf32> to vector<16x32xf32>
      %296 = arith.mulf %285, %295 : vector<16x32xf32>
      %297 = vector.broadcast %278 : vector<1x32xf32> to vector<16x32xf32>
      %298 = arith.mulf %297, %296 : vector<16x32xf32>
      %299 = vector.broadcast %279 : vector<1x32xf32> to vector<16x32xf32>
      %300 = arith.addf %298, %299 : vector<16x32xf32>
      %c0_142 = arith.constant 0 : index
      %c0_143 = arith.constant 0 : index
      %c0_144 = arith.constant 0 : index
      %301 = vector.load %arg21[%c0_142, %c0_143, %c0_144] : memref<1x16x32xf32, #tpu.memory_space<vmem>>, vector<1x16x32xf32>
      %302 = vector.shape_cast %301 : vector<1x16x32xf32> to vector<16x32xf32>
      %303 = vector.shape_cast %300 : vector<16x32xf32> to vector<1x16x32xf32>
      tpu.vector_store %arg21[%c0_142, %c0_143, %c0_144], %303 {strides = array<i32>} : memref<1x16x32xf32, #tpu.memory_space<vmem>>, vector<1x16x32xf32>,
    } else {
    }
    return
  }
  func.func @transform_0(%arg0: i32, %arg1: i32) -> (i32, i32, i32) {
    %c0_i32 = arith.constant 0 : i32
    %c0_i32_0 = arith.constant 0 : i32
    %c0_i32_1 = arith.constant 0 : i32
    return %arg0, %c0_i32, %c0_i32_0 : i32, i32, i32
  }
  func.func @transform_1(%arg0: i32, %arg1: i32) -> (i32, i32, i32) {
    %c0_i32 = arith.constant 0 : i32
    %c0_i32_0 = arith.constant 0 : i32
    %c0_i32_1 = arith.constant 0 : i32
    return %arg0, %c0_i32, %c0_i32_0 : i32, i32, i32
  }
  func.func @transform_2(%arg0: i32, %arg1: i32) -> (i32, i32, i32) {
    %c0_i32 = arith.constant 0 : i32
    %c0_i32_0 = arith.constant 0 : i32
    %c0_i32_1 = arith.constant 0 : i32
    return %arg0, %c0_i32, %c0_i32_0 : i32, i32, i32
  }
  func.func @transform_3(%arg0: i32, %arg1: i32) -> (i32, i32, i32) {
    %c0_i32 = arith.constant 0 : i32
    %c0_i32_0 = arith.constant 0 : i32
    %c0_i32_1 = arith.constant 0 : i32
    return %arg0, %c0_i32, %c0_i32_0 : i32, i32, i32
  }
  func.func @transform_4(%arg0: i32, %arg1: i32) -> (i32, i32, i32) {
    %c0_i32 = arith.constant 0 : i32
    %c0_i32_0 = arith.constant 0 : i32
    %c0_i32_1 = arith.constant 0 : i32
    return %arg1, %c0_i32, %c0_i32_0 : i32, i32, i32
  }
  func.func @transform_5(%arg0: i32, %arg1: i32) -> (i32, i32, i32) {
    %c0_i32 = arith.constant 0 : i32
    %c0_i32_0 = arith.constant 0 : i32
    %c0_i32_1 = arith.constant 0 : i32
    return %arg1, %c0_i32, %c0_i32_0 : i32, i32, i32
  }
  func.func @transform_6(%arg0: i32, %arg1: i32) -> (i32, i32, i32) {
    %c0_i32 = arith.constant 0 : i32
    %c0_i32_0 = arith.constant 0 : i32
    %c0_i32_1 = arith.constant 0 : i32
    return %arg1, %c0_i32, %c0_i32_0 : i32, i32, i32
  }
  func.func @transform_7(%arg0: i32, %arg1: i32) -> (i32, i32, i32) {
    %c0_i32 = arith.constant 0 : i32
    %c0_i32_0 = arith.constant 0 : i32
    %c0_i32_1 = arith.constant 0 : i32
    return %arg1, %c0_i32, %c0_i32_0 : i32, i32, i32
  }
  func.func @transform_8(%arg0: i32, %arg1: i32) -> (i32, i32, i32) {
    %c0_i32 = arith.constant 0 : i32
    %c0_i32_0 = arith.constant 0 : i32
    %c0_i32_1 = arith.constant 0 : i32
    return %arg1, %c0_i32, %c0_i32_0 : i32, i32, i32
  }
  func.func @transform_9(%arg0: i32, %arg1: i32) -> (i32, i32, i32) {
    %c0_i32 = arith.constant 0 : i32
    %c0_i32_0 = arith.constant 0 : i32
    %c0_i32_1 = arith.constant 0 : i32
    return %arg1, %c0_i32, %c0_i32_0 : i32, i32, i32
  }
  func.func @transform_10(%arg0: i32, %arg1: i32) -> (i32, i32, i32, i32) {
    %c0_i32 = arith.constant 0 : i32
    %c0_i32_0 = arith.constant 0 : i32
    %c0_i32_1 = arith.constant 0 : i32
    %c0_i32_2 = arith.constant 0 : i32
    return %arg1, %c0_i32, %c0_i32_0, %c0_i32_1 : i32, i32, i32, i32
  }
  func.func @transform_11(%arg0: i32, %arg1: i32) -> (i32, i32, i32, i32) {
    %c0_i32 = arith.constant 0 : i32
    %c0_i32_0 = arith.constant 0 : i32
    %c0_i32_1 = arith.constant 0 : i32
    %c0_i32_2 = arith.constant 0 : i32
    return %arg1, %c0_i32, %c0_i32_0, %c0_i32_1 : i32, i32, i32, i32
  }
  func.func @transform_12(%arg0: i32, %arg1: i32) -> (i32, i32, i32, i32) {
    %c0_i32 = arith.constant 0 : i32
    %c0_i32_0 = arith.constant 0 : i32
    %c0_i32_1 = arith.constant 0 : i32
    %c0_i32_2 = arith.constant 0 : i32
    return %arg1, %c0_i32, %c0_i32_0, %c0_i32_1 : i32, i32, i32, i32
  }
  func.func @transform_13(%arg0: i32, %arg1: i32) -> (i32, i32, i32) {
    %c0_i32 = arith.constant 0 : i32
    %c0_i32_0 = arith.constant 0 : i32
    %c0_i32_1 = arith.constant 0 : i32
    return %arg1, %c0_i32, %c0_i32_0 : i32, i32, i32
  }
  func.func @transform_14(%arg0: i32, %arg1: i32) -> (i32, i32, i32) {
    %c0_i32 = arith.constant 0 : i32
    %c0_i32_0 = arith.constant 0 : i32
    %c0_i32_1 = arith.constant 0 : i32
    return %arg1, %c0_i32, %c0_i32_0 : i32, i32, i32
  }
  func.func @transform_15(%arg0: i32, %arg1: i32) -> (i32, i32, i32) {
    %c0_i32 = arith.constant 0 : i32
    %c0_i32_0 = arith.constant 0 : i32
    %c0_i32_1 = arith.constant 0 : i32
    return %arg1, %c0_i32, %c0_i32_0 : i32, i32, i32
  }
  func.func @transform_16(%arg0: i32, %arg1: i32) -> (i32, i32, i32) {
    %c0_i32 = arith.constant 0 : i32
    %c0_i32_0 = arith.constant 0 : i32
    %c0_i32_1 = arith.constant 0 : i32
    return %arg1, %c0_i32, %c0_i32_0 : i32, i32, i32
  }
  func.func @transform_17(%arg0: i32, %arg1: i32) -> (i32, i32) {
    %c0_i32 = arith.constant 0 : i32
    %c0_i32_0 = arith.constant 0 : i32
    %c0_i32_1 = arith.constant 0 : i32
    return %c0_i32, %c0_i32_0 : i32, i32
  }
  func.func @transform_18(%arg0: i32, %arg1: i32) -> (i32, i32) {
    %c0_i32 = arith.constant 0 : i32
    %c0_i32_0 = arith.constant 0 : i32
    %c0_i32_1 = arith.constant 0 : i32
    return %c0_i32, %c0_i32_0 : i32, i32
  }
  func.func @transform_19(%arg0: i32, %arg1: i32) -> (i32, i32, i32) {
    %c0_i32 = arith.constant 0 : i32
    %c0_i32_0 = arith.constant 0 : i32
    %c0_i32_1 = arith.constant 0 : i32
    return %arg0, %c0_i32, %c0_i32_0 : i32, i32, i32
  }
}

</mosaic_0001>

<bundles_post_ra>
// kernel: tpu_custom_call.1
= control target key start
LH: loop header
LB: loop body
LE: loop exit
PB: predicated region body
PF: predicated region fallthrough
CT: control target
= control target key end

     0   :  { %s6125_s0 = inlined_call_operand.vmem [shape: f32[1,16,32], index: 0, kind: input, shape index: {}]   ;;  %s6126_s1 = inlined_call_operand.vmem [shape: f32[1,16,32], index: 1, kind: input, shape index: {}]   ;;  %s6127_s2 = inlined_call_operand.hbm [shape: f32[1,16,16], index: 2, kind: input, shape index: {}]   ;;  %s6128_s3 = inlined_call_operand.hbm [shape: f32[1,16,16], index: 3, kind: input, shape index: {}]   ;;  %s6129_s4 = inlined_call_operand.vmem [shape: f32[2,32,96], index: 4, kind: input, shape index: {}]   ;;  %s6130_s5 = inlined_call_operand.hbm [shape: f32[2,1,96], index: 5, kind: input, shape index: {}]   ;;  %s6131_s6 = inlined_call_operand.hbm [shape: f32[2,32,32], index: 6, kind: input, shape index: {}]   ;;  %s6132_s7 = inlined_call_operand.hbm [shape: f32[2,1,32], index: 7, kind: input, shape index: {}]   ;;  %s6133_s8 = inlined_call_operand.hbm [shape: f32[2,32,64], index: 8, kind: input, shape index: {}]   ;;  %s6134_s9 = inlined_call_operand.hbm [shape: f32[2,1,64], index: 9, kind: input, shape index: {}]   ;;  %s6135_s10 = inlined_call_operand.vmem [shape: f32[2,2,32,32], index: 10, kind: input, shape index: {}]   ;;  %s6136_s11 = inlined_call_operand.hbm [shape: f32[2,2,1,32], index: 11, kind: input, shape index: {}]   ;;  %s6137_s12 = inlined_call_operand.vmem [shape: f32[2,6,1,32], index: 12, kind: input, shape index: {}]   ;;  %s6138_s13 = inlined_call_operand.hbm [shape: f32[2,32,64], index: 13, kind: input, shape index: {}]   ;;  %s6139_s14 = inlined_call_operand.vmem [shape: f32[2,1,64], index: 14, kind: input, shape index: {}]   ;;  %s6140_s15 = inlined_call_operand.vmem [shape: f32[2,64,32], index: 15, kind: input, shape index: {}]   ;;  %s6141_s16 = inlined_call_operand.vmem [shape: f32[2,1,32], index: 16, kind: input, shape index: {}]   ;;  %s6142_s17 = inlined_call_operand.vmem [shape: f32[1,32], index: 17, kind: input, shape index: {}]   ;;  %s6143_s18 = inlined_call_operand.vmem [shape: f32[1,32], index: 18, kind: input, shape index: {}]   ;;  %s6144_s19 = inlined_call_operand.hbm [shape: f32[1,16,32], index: 19, kind: output, shape index: {}]  }
   0x1   :  { %6174 = sst [smem:[#allocation26_spill]] %s6125_s0 }
   0x2   :  { %6175 = sst [smem:[#allocation27_spill]] %s6126_s1 }
   0x3   :  { %6176 = sst [smem:[#allocation28_spill]] %s6127_s2 }
   0x4   :  { %6177 = sst [smem:[#allocation29_spill]] %s6128_s3 }
   0x5   :  { %6178 = sst [smem:[#allocation30_spill]] %s6129_s4 }
   0x6   :  { %6179 = sst [smem:[#allocation31_spill]] %s6130_s5 }
   0x7   :  { %6180 = sst [smem:[#allocation32_spill]] %s6131_s6 }
   0x8   :  { %6181 = sst [smem:[#allocation33_spill]] %s6132_s7 }
   0x9   :  { %6182 = sst [smem:[#allocation34_spill]] %s6133_s8 }
   0xa   :  { %6183 = sst [smem:[#allocation35_spill]] %s6134_s9 }
   0xb   :  { %6184 = sst [smem:[#allocation36_spill]] %s6135_s10 }
   0xc   :  { %6185 = sst [smem:[#allocation37_spill]] %s6136_s11 }
   0xd   :  { %6186 = sst [smem:[#allocation38_spill]] %s6137_s12 }
   0xe   :  { %6187 = sst [smem:[#allocation39_spill]] %s6138_s13 }
   0xf   :  { %6188 = sst [smem:[#allocation40_spill]] %s6139_s14 }
  0x10   :  { %6189 = sst [smem:[#allocation41_spill]] %s6140_s15 }
  0x11   :  { %6190 = sst [smem:[#allocation42_spill]] %s6141_s16 }
  0x12   :  { %6191 = sst [smem:[#allocation43_spill]] %s6142_s17 }
  0x13   :  { %6192 = sst [smem:[#allocation44_spill]] %s6143_s18 }
  0x14   :  { %6193 = sst [smem:[#allocation45_spill]] %s6144_s19 }
  0x15   :  { %24 = vsyncpa [#allocation4], 0 }
  0x16   :  { %25 = vsyncpa [#allocation7], 0 }
  0x17   :  { %26 = vsyncpa [#allocation5], 0  ;;  %s5278_s0 = smov 0   ;;  %s5280_s30 = smov 0  }
  0x18   :  { %s5282_s20 = smov 0   ;;  %s5284_s21 = smov 0  }
  0x19   :  { %s5286_s1 = smov 0   ;;  %s5288_s22 = smov 0  }
  0x1a LB: > { %6194 = sst [smem:[#allocation20_spill]] %s5135_s20  ;;  %s5307_s2 = sadd.s32 4294967295, %s5147_s22   ;;  %s5147_s22 = sphi %s5288_s22, %s32_s22   ;;  %s5143_s1 = sphi %s5286_s1, %s6258_s1   ;;  %s5139_s21 = sphi %s5284_s21, %s6257_s21   ;;  %s5135_s20 = sphi %s5282_s20, %s6253_s20   ;;  %s5131_s30 = sphi %s5280_s30, %s6256_s30   ;;  %s5127_s0 = sphi %s5278_s0, %s6255_s0  }
  0x1b   : > { %6195 = sst [smem:[#allocation21_spill]] %s5139_s21  ;;  %p188_p0 = scmp.ne.s32.totalorder %s5135_s20, %s5131_s30 }
  0x1c   : > { %6196 = sst [smem:[#allocation22_spill]] %s5147_s22  ;;  %p189_p1 = scmp.eq.s32.totalorder %s5147_s22, 0 }
  0x1d   : > { %p194_p2 = scmp.ne.s32.totalorder %s5131_s30, %s5127_s0  ;;  %p6150_p3 = scmp.eq.s32.totalorder %s5307_s2, 0 }
  0x1e   : > { %p190_p4 = por %p189_p1, %p188_p0  ;;  %p3904_p5 = scmp.ge.s32.totalorder %s5147_s22, 1 }
  0x1f   : > { %p5318_p6 = por %p6150_p3, %p194_p2  ;;  %p559_p7 = scmp.lt.s32.totalorder %s5147_s22, 3 }
  0x20   : > { %s5149_s3 = smov [#allocation3]   ;;  %p4547_p10 = scmp.lt.s32.totalorder %s5147_s22, 2 }
  0x21   : > { %s6197_s24 = scalar_select %p5318_p6, 1, 0 }
  0x22   : > { %p5323_p8 = pnand %p3904_p5, %p559_p7  ;;  %s590_s26 = sshll.u32 %s5149_s3, 4  ;;  %s591_s26 = int_to_ptr.vmem [resolvable:$true] %s590_s26 }
  0x23   : > { %6198 = sst [smem:[#allocation23_spill]] %s6197_s24  ;;  %p5336_p12 = pnand %p4547_p10, %p190_p4 }
  0x24   : > { %s6199_s25 = scalar_select %p5323_p8, 1, 0 }
  0x25   : > { %p4516_p9 = pneg %p5323_p8  ;;  %s41_s29 = sadd.s32 1, %s5143_s1 }
  0x26   : > { %s6201_s28 = scalar_select %p5336_p12, 1, 0 }
  0x27   : > { %p5332_p11 = pnand %p4516_p9, %p6150_p3  ;;  %s6202_s19 = sld [smem:[#allocation28_spill]] }
  0x29   : > { %s6200_s27 = scalar_select %p5332_p11, 1, 0 }
  0x2a   : > { %p6161_p0 = pneg %p5332_p11 }
  0x2d   : > { %s4793_s3 = scalar_lea.hbm %s6202_s19, 256 }
  0x2e   : > { %p4794_p13 = scmp.ne.s32.totalorder %s6202_s19, %s4793_s3  ;;  %p4800_p4 = scmp.lt.u32.totalorder %s4793_s3, %s6202_s19 }
  0x30   : > { %p4796_p1 = pnand %p6161_p0, %p4794_p13 }
  0x32   : > { %p4797_p2 = pneg %p4796_p1 }
  0x34   : > { %p4802_p5 = pnand %p4800_p4, %p4797_p2 }
  0x36   : > { %4805 = shalt.err (!%p4802_p5)
}
  0x37   : > { %s4806_s15 = scalar_lea.vmem %s591_s26, 256  ;;  %p4814_p3 = scmp.lt.s32.totalorder %s591_s26, %s591_s26 }
  0x38   : > { %p4807_p7 = scmp.ne.s32.totalorder %s591_s26, %s4806_s15  ;;  %p4815_p6 = scmp.lt.s32.totalorder %s4806_s15, %s4806_s15 }
  0x3a   : > { %p4809_p9 = pnand %p4807_p7, %p6161_p0  ;;  %p4816_p8 = por %p4815_p6, %p4814_p3 }
  0x3c   : > { %p4810_p10 = pneg %p4809_p9 }
  0x3e   : > { %p4817_p12 = pnand %p4816_p8, %p4810_p10 }
  0x40   : > { %4820 = shalt.err (!%p4817_p12)
}
  0x41   : > { %s6154_s17 = smov 128   ;;  %s6156_s12 = smov 8  }
  0x42   : > { %4519 = dma.hbm_to_vmem [thread:$0]  (!%p5332_p11), %s6202_s19, 256, %s591_s26, [#allocation4], %s6154_s17, %s6154_s17, %s6156_s12  }
  0x43   : > { %p42_p3 = scmp.ge.s32.totalorder %s41_s29, 2  ;;  %s634_s15 = sand.u32 1, %s5147_s22  }
  0x44   : > { %s5368_s23 = sand.u32 1, %s5135_s20   ;;  %s5375_s3 = sshll.u32 %s5143_s1, 4 }
  0x45   : > { %s6260_s29 = smov (%p42_p3, %s41_s29), 0  ;;  %s6204_s5 = sld [smem:[#allocation31_spill]] }
  0x46   : > { %6203 = sst [smem:[#allocation24_spill]] %s6260_s29  ;;  %s178_s0 = ssub.s32 %s5143_s1, %s6260_s29 }
  0x47   : > { %p179_p6 = scmp.eq.s32.totalorder %s178_s0, 0  ;;  %s637_s26 = scalar_lea.vmem [#allocation8], %s5368_s23 }
  0x48   : > { %s644_s18 = sshll.u32 %s637_s26, 4  ;;  %s5385_s17 = sshll.u32 %s5368_s23, 5  ;;  %s5392_s18 = int_to_ptr.vmem [resolvable:$true] %s644_s18 }
  0x49   : > { %s6205_s12 = sadd.s32 1, %s5135_s20  ;;  %s5394_s29 = scalar_lea.sflag [#allocation4], %s634_s15 }
  0x4a   : > { %s5390_s19 = scalar_select %p179_p6, %s5135_s20, %s6205_s12  }
  0x4b   : > { %s5381_s16 = scalar_lea.hbm %s6204_s5, %s5375_s3  ;;  %p6207_p12 = scmp.ne.s32.totalorder %s6201_s28, 0 }
  0x4c   : > { %6206 = sst [smem:[#allocation25_spill]] %s5390_s19  ;;  %s4821_s0 = scalar_lea.hbm %s5381_s16, 16 }
  0x4d   : > { %p4822_p8 = scmp.ne.s32.totalorder %s5381_s16, %s4821_s0  ;;  %p5400_p13 = pneg %p6207_p12 }
  0x4e   : > { %s4826_s12 = scalar_lea.hbm %s6204_s5, 32  ;;  %p4827_p4 = scmp.lt.u32.totalorder %s5381_s16, %s6204_s5 }
  0x4f   : > { %s6208_s10 = scalar_select %p5400_p13, 1, 0 }
  0x50   : > { %p4824_p1 = pnand %p5400_p13, %p4822_p8  ;;  %p4828_p5 = scmp.lt.u32.totalorder %s4826_s12, %s4821_s0 }
  0x51   : > { %p4830_p9 = scmp.lt.u32.totalorder %s4821_s0, %s5381_s16 }
  0x52   : > { %p4825_p2 = pneg %p4824_p1  ;;  %p4829_p7 = por %p4828_p5, %p4827_p4 }
  0x54   : > { %p4831_p10 = por %p4830_p9, %p4829_p7 }
  0x56   : > { %p4832_p3 = pnand %p4831_p10, %p4825_p2 }
  0x58   : > { %4835 = shalt.err (!%p4832_p3)
}
  0x59   : > { %s4836_s15 = scalar_lea.vmem %s5392_s18, 16  ;;  %s5152_s14 = smov [#allocation8]  }
  0x5a   : > { %p4837_p6 = scmp.ne.s32.totalorder %s5392_s18, %s4836_s15  ;;  %s4841_s26 = sshll.u32 %s5152_s14, 4  ;;  %s4842_s26 = int_to_ptr.vmem [resolvable:$false] %s4841_s26 }
  0x5b   : > { %s4843_s19 = scalar_lea.vmem %s4842_s26, 32  ;;  %p4844_p0 = scmp.lt.s32.totalorder %s5392_s18, %s4842_s26 }
  0x5c   : > { %p4839_p8 = pnand %p4837_p6, %p5400_p13  ;;  %p4845_p11 = scmp.lt.s32.totalorder %s4843_s19, %s4836_s15 }
  0x5e   : > { %p4840_p1 = pneg %p4839_p8  ;;  %p4846_p4 = por %p4845_p11, %p4844_p0 }
  0x60   : > { %p4847_p5 = pnand %p4846_p4, %p4840_p1 }
  0x62   : > { %4850 = shalt.err (!%p4847_p5)
}
  0x63   : > { %4526 = dma.hbm_to_vmem [thread:$0]  (!%p6207_p12), %s5381_s16, 16, %s5392_s18, %s5394_s29  }
  0x64   : > { %s5425_s20 = sshll.u32 %s5143_s1, 9  ;;  %s655_s0 = scalar_lea.vmem [#allocation9], %s5385_s17 }
  0x65   : > { %s662_s12 = sshll.u32 %s655_s0, 4  ;;  %s6209_s6 = sld [smem:[#allocation32_spill]]  ;;  %s5434_s12 = int_to_ptr.vmem [resolvable:$true] %s662_s12 }
  0x6b   : > { %s5432_s15 = scalar_lea.hbm %s6209_s6, %s5425_s20  ;;  %s4856_s0 = scalar_lea.hbm %s6209_s6, 1024 }
  0x6c   : > { %s4851_s19 = scalar_lea.hbm %s5432_s15, 512  ;;  %p4857_p7 = scmp.lt.u32.totalorder %s5432_s15, %s6209_s6 }
  0x6d   : > { %p4852_p11 = scmp.ne.s32.totalorder %s5432_s15, %s4851_s19  ;;  %p4858_p9 = scmp.lt.u32.totalorder %s4856_s0, %s4851_s19 }
  0x6e   : > { %p4860_p3 = scmp.lt.u32.totalorder %s4851_s19, %s5432_s15 }
  0x6f   : > { %p4854_p0 = pnand %p4852_p11, %p5400_p13  ;;  %p4859_p10 = por %p4858_p9, %p4857_p7 }
  0x71   : > { %p4855_p2 = pneg %p4854_p0  ;;  %p4861_p6 = por %p4860_p3, %p4859_p10 }
  0x73   : > { %p4862_p8 = pnand %p4861_p6, %p4855_p2 }
  0x75   : > { %4865 = shalt.err (!%p4862_p8)
}
  0x76   : > { %s4866_s14 = scalar_lea.vmem %s5434_s12, 512  ;;  %s5153_s26 = smov [#allocation9]  }
  0x77   : > { %p4867_p1 = scmp.ne.s32.totalorder %s5434_s12, %s4866_s14  ;;  %s4871_s16 = sshll.u32 %s5153_s26, 4  ;;  %s4872_s16 = int_to_ptr.vmem [resolvable:$false] %s4871_s16 }
  0x78   : > { %s4873_s5 = scalar_lea.vmem %s4872_s16, 1024  ;;  %p4874_p11 = scmp.lt.s32.totalorder %s5434_s12, %s4872_s16 }
  0x79   : > { %p4869_p4 = pnand %p4867_p1, %p5400_p13  ;;  %p4875_p0 = scmp.lt.s32.totalorder %s4873_s5, %s4866_s14 }
  0x7b   : > { %p4870_p5 = pneg %p4869_p4  ;;  %p4876_p7 = por %p4875_p0, %p4874_p11 }
  0x7d   : > { %p4877_p9 = pnand %p4876_p7, %p4870_p5 }
  0x7f   : > { %4880 = shalt.err (!%p4877_p9)
}
  0x80   : > { %s6210_s22 = smov 8   ;;  %s6211_s19 = smov 128  }
  0x81   : > { %4529 = dma.hbm_to_vmem [thread:$0]  (!%p6207_p12), %s5432_s15, 512, %s5434_s12, %s5394_s29, %s6211_s19, %s6211_s19, %s6210_s22  }
  0x82   : > { %s6212_s7 = sld [smem:[#allocation33_spill]]  ;;  %s675_s26 = scalar_lea.vmem [#allocation10], %s5368_s23 }
  0x83   : > { %s682_s16 = sshll.u32 %s675_s26, 4  ;;  %s6213_s8 = sld [smem:[#allocation34_spill]]  ;;  %s683_s16 = int_to_ptr.vmem [resolvable:$true] %s682_s16 }
  0x88   : > { %s5465_s14 = scalar_lea.hbm %s6212_s7, %s5375_s3  ;;  %s4886_s18 = scalar_lea.hbm %s6212_s7, 32 }
  0x89   : > { %s5472_s4 = scalar_lea.hbm %s6213_s8, %s5425_s20  ;;  %s4881_s21 = scalar_lea.hbm %s5465_s14, 16 }
  0x8a   : > { %p4882_p2 = scmp.ne.s32.totalorder %s5465_s14, %s4881_s21  ;;  %p4887_p6 = scmp.lt.u32.totalorder %s5465_s14, %s6212_s7 }
  0x8b   : > { %p4888_p8 = scmp.lt.u32.totalorder %s4886_s18, %s4881_s21  ;;  %p4890_p4 = scmp.lt.u32.totalorder %s4881_s21, %s5465_s14 }
  0x8c   : > { %p4884_p10 = pnand %p4882_p2, %p5400_p13 }
  0x8d   : > { %p4889_p1 = por %p4888_p8, %p4887_p6 }
  0x8e   : > { %p4885_p3 = pneg %p4884_p10 }
  0x8f   : > { %p4891_p5 = por %p4890_p4, %p4889_p1 }
  0x91   : > { %p4892_p11 = pnand %p4891_p5, %p4885_p3 }
  0x93   : > { %4895 = shalt.err (!%p4892_p11)
}
  0x94   : > { %s4896_s6 = scalar_lea.vmem %s683_s16, 16  ;;  %s5154_s26 = smov [#allocation10]  }
  0x95   : > { %p4897_p0 = scmp.ne.s32.totalorder %s683_s16, %s4896_s6  ;;  %s4901_s5 = sshll.u32 %s5154_s26, 4  ;;  %s4902_s5 = int_to_ptr.vmem [resolvable:$false] %s4901_s5 }
  0x96   : > { %s4903_s12 = scalar_lea.vmem %s4902_s5, 32  ;;  %p4904_p2 = scmp.lt.s32.totalorder %s683_s16, %s4902_s5 }
  0x97   : > { %p4899_p7 = pnand %p4897_p0, %p5400_p13  ;;  %p4905_p10 = scmp.lt.s32.totalorder %s4903_s12, %s4896_s6 }
  0x99   : > { %p4900_p9 = pneg %p4899_p7  ;;  %p4906_p12 = por %p4905_p10, %p4904_p2 }
  0x9b   : > { %p4907_p6 = pnand %p4906_p12, %p4900_p9 }
  0x9d   : > { %4910 = shalt.err (!%p4907_p6)
}
  0x9e   : > { %p6214_p8 = scmp.ne.s32.totalorder %s6201_s28, 0  ;;  %s693_s21 = scalar_lea.vmem [#allocation11], %s5385_s17 }
  0x9f   : > { %s700_s24 = sshll.u32 %s693_s21, 4  ;;  %s6215_s9 = sld [smem:[#allocation35_spill]]  ;;  %s5493_s24 = int_to_ptr.vmem [resolvable:$true] %s700_s24 }
  0xa0   : > { %4532 = dma.hbm_to_vmem [thread:$0]  (!%p6214_p8), %s5465_s14, 16, %s683_s16, %s5394_s29  }
  0xa1   : > { %s4911_s6 = scalar_lea.hbm %s5472_s4, 512  ;;  %s4916_s12 = scalar_lea.hbm %s6213_s8, 1024 }
  0xa2   : > { %p4912_p12 = scmp.ne.s32.totalorder %s5472_s4, %s4911_s6  ;;  %p4917_p4 = scmp.lt.u32.totalorder %s5472_s4, %s6213_s8 }
  0xa3   : > { %p4918_p5 = scmp.lt.u32.totalorder %s4916_s12, %s4911_s6  ;;  %p4920_p0 = scmp.lt.u32.totalorder %s4911_s6, %s5472_s4 }
  0xa4   : > { %p4914_p3 = pnand %p4912_p12, %p5400_p13 }
  0xa5   : > { %s5499_s0 = scalar_lea.hbm %s6215_s9, %s5375_s3  ;;  %p4919_p11 = por %p4918_p5, %p4917_p4 }
  0xa6   : > { %p4915_p1 = pneg %p4914_p3 }
  0xa7   : > { %p4921_p7 = por %p4920_p0, %p4919_p11 }
  0xa9   : > { %p4922_p9 = pnand %p4921_p7, %p4915_p1 }
  0xab   : > { %4925 = shalt.err (!%p4922_p9)
}
  0xac   : > { %s4926_s3 = scalar_lea.vmem %s5493_s24, 512  ;;  %s5155_s16 = smov [#allocation11]  }
  0xad   : > { %p4927_p2 = scmp.ne.s32.totalorder %s5493_s24, %s4926_s3  ;;  %s4931_s21 = sshll.u32 %s5155_s16, 4  ;;  %s4932_s21 = int_to_ptr.vmem [resolvable:$false] %s4931_s21 }
  0xae   : > { %s4933_s7 = scalar_lea.vmem %s4932_s21, 1024  ;;  %p4934_p12 = scmp.lt.s32.totalorder %s5493_s24, %s4932_s21 }
  0xaf   : > { %p4929_p10 = pnand %p4927_p2, %p5400_p13  ;;  %p4935_p3 = scmp.lt.s32.totalorder %s4933_s7, %s4926_s3 }
  0xb1   : > { %p4930_p6 = pneg %p4929_p10  ;;  %p4936_p4 = por %p4935_p3, %p4934_p12 }
  0xb3   : > { %p4937_p5 = pnand %p4936_p4, %p4930_p6 }
  0xb5   : > { %4940 = shalt.err (!%p4937_p5)
}
  0xb6   : > { %4535 = dma.hbm_to_vmem [thread:$0]  (!%p6214_p8), %s5472_s4, 512, %s5493_s24, %s5394_s29, %s6211_s19, %s6211_s19, %s6210_s22  }
  0xb7   : > { %s713_s15 = scalar_lea.vmem [#allocation12], %s5368_s23  ;;  %s3919_s6 = sshll.u32 %s5368_s23, 1 }
  0xb8   : > { %s720_s18 = sshll.u32 %s713_s15, 4  ;;  %s4941_s26 = scalar_lea.hbm %s5499_s0, 16  ;;  %s721_s18 = int_to_ptr.vmem [resolvable:$true] %s720_s18 }
  0xb9   : > { %p4942_p1 = scmp.ne.s32.totalorder %s5499_s0, %s4941_s26  ;;  %s4946_s14 = scalar_lea.hbm %s6215_s9, 32 }
  0xba   : > { %p4947_p7 = scmp.lt.u32.totalorder %s5499_s0, %s6215_s9  ;;  %p4948_p9 = scmp.lt.u32.totalorder %s4946_s14, %s4941_s26 }
  0xbb   : > { %p4944_p11 = pnand %p4942_p1, %p5400_p13  ;;  %p4950_p10 = scmp.lt.u32.totalorder %s4941_s26, %s5499_s0 }
  0xbc   : > { %p4949_p2 = por %p4948_p9, %p4947_p7 }
  0xbd   : > { %p4945_p0 = pneg %p4944_p11 }
  0xbe   : > { %p4951_p6 = por %p4950_p10, %p4949_p2 }
  0xc0   : > { %p4952_p12 = pnand %p4951_p6, %p4945_p0 }
  0xc2   : > { %4955 = shalt.err (!%p4952_p12)
}
  0xc3   : > { %s4956_s4 = scalar_lea.vmem %s721_s18, 16  ;;  %s5156_s24 = smov [#allocation12]  }
  0xc4   : > { %p4957_p3 = scmp.ne.s32.totalorder %s721_s18, %s4956_s4  ;;  %s4961_s21 = sshll.u32 %s5156_s24, 4  ;;  %s4962_s21 = int_to_ptr.vmem [resolvable:$false] %s4961_s21 }
  0xc5   : > { %s4963_s7 = scalar_lea.vmem %s4962_s21, 32  ;;  %p4964_p1 = scmp.lt.s32.totalorder %s721_s18, %s4962_s21 }
  0xc6   : > { %p4959_p4 = pnand %p4957_p3, %p5400_p13  ;;  %p4965_p11 = scmp.lt.s32.totalorder %s4963_s7, %s4956_s4 }
  0xc8   : > { %p4960_p5 = pneg %p4959_p4  ;;  %p4966_p8 = por %p4965_p11, %p4964_p1 }
  0xca   : > { %p4967_p7 = pnand %p4966_p8, %p4960_p5 }
  0xcc   : > { %4970 = shalt.err (!%p4967_p7)
}
  0xcd   : > { %p6216_p9 = scmp.ne.s32.totalorder %s6201_s28, 0  ;;  %s4033_s15 = sshll.u32 %s5143_s1, 5 }
  0xce   : > { %s739_s26 = scalar_lea.vmem [#allocation13], %s3919_s6  ;;  %s6217_s11 = sld [smem:[#allocation37_spill]] }
  0xcf   : > { %4538 = dma.hbm_to_vmem [thread:$0]  (!%p6216_p9), %s5499_s0, 16, %s721_s18, %s5394_s29  }
  0xd0   : > { %s746_s5 = sshll.u32 %s739_s26, 4  ;;  %s5554_s5 = int_to_ptr.vmem [resolvable:$true] %s746_s5 }
  0xd4   : > { %s5552_s3 = scalar_lea.hbm %s6217_s11, %s4033_s15  ;;  %s4976_s18 = scalar_lea.hbm %s6217_s11, 64 }
  0xd5   : > { %s4971_s16 = scalar_lea.hbm %s5552_s3, 32  ;;  %p4977_p10 = scmp.lt.u32.totalorder %s5552_s3, %s6217_s11 }
  0xd6   : > { %p4972_p8 = scmp.ne.s32.totalorder %s5552_s3, %s4971_s16  ;;  %p4978_p6 = scmp.lt.u32.totalorder %s4976_s18, %s4971_s16 }
  0xd7   : > { %p4980_p3 = scmp.lt.u32.totalorder %s4971_s16, %s5552_s3 }
  0xd8   : > { %p4974_p0 = pnand %p4972_p8, %p5400_p13  ;;  %p4979_p12 = por %p4978_p6, %p4977_p10 }
  0xda   : > { %p4975_p2 = pneg %p4974_p0  ;;  %p4981_p4 = por %p4980_p3, %p4979_p12 }
  0xdc   : > { %p4982_p5 = pnand %p4981_p4, %p4975_p2 }
  0xde   : > { %4985 = shalt.err (!%p4982_p5)
}
  0xdf   : > { %s4986_s24 = scalar_lea.vmem %s5554_s5, 32  ;;  %s5157_s21 = smov [#allocation13]  }
  0xe0   : > { %p4987_p1 = scmp.ne.s32.totalorder %s5554_s5, %s4986_s24  ;;  %s4991_s7 = sshll.u32 %s5157_s21, 4  ;;  %s4992_s7 = int_to_ptr.vmem [resolvable:$false] %s4991_s7 }
  0xe1   : > { %s4993_s15 = scalar_lea.vmem %s4992_s7, 64  ;;  %p4994_p8 = scmp.lt.s32.totalorder %s5554_s5, %s4992_s7 }
  0xe2   : > { %p4989_p11 = pnand %p4987_p1, %p5400_p13  ;;  %p4995_p0 = scmp.lt.s32.totalorder %s4993_s15, %s4986_s24 }
  0xe4   : > { %p4990_p7 = pneg %p4989_p11  ;;  %p4996_p10 = por %p4995_p0, %p4994_p8 }
  0xe6   : > { %p4997_p6 = pnand %p4996_p10, %p4990_p7 }
  0xe8   : > { %5000 = shalt.err (!%p4997_p6)
}
  0xe9   : > { %s5158_s26 = smov 16   ;;  %s5159_s12 = smov 1  }
  0xea   : > { %4541 = dma.hbm_to_vmem [thread:$0]  (!%p6216_p9), %s5552_s3, 32, %s5554_s5, %s5394_s29, %s5158_s26, %s5158_s26, %s5159_s12  }
  0xeb   : > { %s5160_s14 = smov [#allocation6]   ;;  %s6218_s13 = sld [smem:[#allocation39_spill]] }
  0xec   : > { %s606_s16 = sshll.u32 %s5160_s14, 4  ;;  %s767_s6 = scalar_lea.vmem [#allocation14], %s5385_s17  ;;  %s607_s16 = int_to_ptr.vmem [resolvable:$true] %s606_s16 }
  0xed   : > { %s774_s4 = sshll.u32 %s767_s6, 4  ;;  %s6219_s7 = sld [smem:[#allocation29_spill]]  ;;  %s5608_s4 = int_to_ptr.vmem [resolvable:$true] %s774_s4 }
  0xee   : > { %p6220_p12 = scmp.ne.s32.totalorder %s6200_s27, 0 }
  0xf0   : > { %p6221_p3 = pneg %p6220_p12 }
  0xf1   : > { %s5582_s18 = scalar_lea.hbm %s6218_s13, %s5425_s20 }
  0xf3   : > { %s5001_s15 = scalar_lea.hbm %s6219_s7, 256 }
  0xf4   : > { %p5002_p2 = scmp.ne.s32.totalorder %s6219_s7, %s5001_s15  ;;  %p5008_p1 = scmp.lt.u32.totalorder %s5001_s15, %s6219_s7 }
  0xf6   : > { %p5004_p4 = pnand %p5002_p2, %p6221_p3 }
  0xf8   : > { %p5005_p5 = pneg %p5004_p4 }
  0xfa   : > { %p5010_p11 = pnand %p5008_p1, %p5005_p5 }
  0xfc   : > { %5013 = shalt.err (!%p5010_p11)
}
  0xfd   : > { %s5014_s17 = scalar_lea.vmem %s607_s16, 256  ;;  %p6222_p8 = pmov %p6221_p3 }
  0xfe   : > { %p5015_p7 = scmp.ne.s32.totalorder %s607_s16, %s5014_s17  ;;  %p5022_p6 = scmp.lt.s32.totalorder %s607_s16, %s607_s16 }
  0xff   : > { %p5023_p9 = scmp.lt.s32.totalorder %s5014_s17, %s5014_s17 }
 0x100   : > { %p5017_p0 = pnand %p5015_p7, %p6222_p8 }
 0x101   : > { %p5024_p13 = por %p5023_p9, %p5022_p6 }
 0x102   : > { %p5018_p10 = pneg %p5017_p0 }
 0x104   : > { %p5025_p2 = pnand %p5024_p13, %p5018_p10 }
 0x106   : > { %5028 = shalt.err (!%p5025_p2)
}
 0x107   : > { %4522 = dma.hbm_to_vmem [thread:$0]  (!%p6220_p12), %s6219_s7, 256, %s607_s16, [#allocation7], %s6211_s19, %s6211_s19, %s6210_s22  }
 0x108   : > { %s5029_s20 = scalar_lea.hbm %s5582_s18, 512  ;;  %p6223_p13 = scmp.ne.s32.totalorder %s6208_s10, 0 }
 0x109   : > { %p5030_p9 = scmp.ne.s32.totalorder %s5582_s18, %s5029_s20  ;;  %s5034_s12 = scalar_lea.hbm %s6218_s13, 1024 }
 0x10a   : > { %p5035_p5 = scmp.lt.u32.totalorder %s5582_s18, %s6218_s13  ;;  %p5036_p1 = scmp.lt.u32.totalorder %s5034_s12, %s5029_s20 }
 0x10b   : > { %p5032_p3 = pnand %p5030_p9, %p6223_p13  ;;  %p5038_p7 = scmp.lt.u32.totalorder %s5029_s20, %s5582_s18 }
 0x10c   : > { %p5037_p11 = por %p5036_p1, %p5035_p5 }
 0x10d   : > { %p5033_p4 = pneg %p5032_p3 }
 0x10e   : > { %p5039_p8 = por %p5038_p7, %p5037_p11 }
 0x110   : > { %p5040_p12 = pnand %p5039_p8, %p5033_p4 }
 0x112   : > { %5043 = shalt.err (!%p5040_p12)
}
 0x113   : > { %s5044_s16 = scalar_lea.vmem %s5608_s4, 512  ;;  %s5161_s23 = smov [#allocation14]  }
 0x114   : > { %p5045_p0 = scmp.ne.s32.totalorder %s5608_s4, %s5044_s16  ;;  %s5049_s6 = sshll.u32 %s5161_s23, 4  ;;  %s5050_s6 = int_to_ptr.vmem [resolvable:$false] %s5049_s6 }
 0x115   : > { %s5051_s24 = scalar_lea.vmem %s5050_s6, 1024  ;;  %p5052_p2 = scmp.lt.s32.totalorder %s5608_s4, %s5050_s6 }
 0x116   : > { %p5047_p10 = pnand %p5045_p0, %p6223_p13  ;;  %p5053_p9 = scmp.lt.s32.totalorder %s5051_s24, %s5044_s16 }
 0x118   : > { %p5048_p6 = pneg %p5047_p10  ;;  %p5054_p3 = por %p5053_p9, %p5052_p2 }
 0x11a   : > { %p5055_p5 = pnand %p5054_p3, %p5048_p6 }
 0x11c   : > { %5058 = shalt.err (!%p5055_p5)
}
 0x11d   : > { %p6224_p4 = scmp.ne.s32.totalorder %s6201_s28, 0  ;;  %p6225_p13 = scmp.ne.s32.totalorder %s6199_s25, 0 }
 0x11e   : > { %p6226_p1 = scmp.eq.s32.totalorder (!%p6225_p13), %s5307_s2, 0 }
 0x11f   : > { %4544 = dma.hbm_to_vmem [thread:$0]  (!%p6224_p4), %s5582_s18, 512, %s5608_s4, %s5394_s29, %s6211_s19, %s6211_s19, %s6210_s22  }
 0x120   : > { %806 = sbr.rel (%p6225_p13) target bundleno = 7155 (0x1bf3), region = 96 }
 0x127   : > { %5110 = dma.done.wait (%p6226_p1), [#allocation4], 256   ;;  %p6227_p11 = pmov %p6226_p1 }
 0x128   : > { %p6228_p7 = pmov %p6226_p1 }
 0x129   : > { %5112 = vsyncadd (%p6227_p11), [#allocation4], 4294967040 }
 0x12a   : > { %5114 = dma.done.wait (%p6228_p7), [#allocation7], 256   ;;  %p6229_p8 = pmov %p6226_p1 }
 0x12b   : > { %s6230_s28 = sld [smem:[#allocation23_spill]]  ;;  %s816_s10 = sand.u32 1, %s5307_s2  }
 0x12c   : > { %5116 = vsyncadd (%p6229_p8), [#allocation7], 4294967040  ;;  %s5647_s29 = sand.u32 1, %s5131_s30   ;;  %s817_s25 = scalar_lea.sflag [#allocation4], %s816_s10 }
 0x131   : > { %p6231_p12 = scmp.ne.s32.totalorder %s6230_s28, 0 }
 0x133   : > { %5118 = dma.done.wait (%p6231_p12), %s817_s25, 1616  }
 0x134   : > { %5120 = vsyncadd (%p6231_p12), %s817_s25, 4294965680  ;;  %s6232_s19 = sld [smem:[#allocation21_spill]]  ;;  %s3928_s18 = sshll.u32 %s5647_s29, 5 }
 0x135   : > { %s3930_s4 = sshll.u32 %s5647_s29, 1  ;;  %s6233_s8 = sld [smem:[#allocation30_spill]] }
 0x136   : > { %s6234_s26 = sld [smem:[#allocation36_spill]]  ;;  %s6235_s23 = sld [smem:[#allocation40_spill]] }
 0x137   : > { %s6236_s10 = sld [smem:[#allocation41_spill]]  ;;  %s6238_s11 = sld [smem:[#allocation38_spill]] }
 0x138   : > { %s5691_s27 = scalar_lea.vmem [#allocation9], %s3928_s18  ;;  %s5694_s13 = scalar_lea.vmem [#allocation11], %s3928_s18 }
 0x139   : > { %s853_s0 = scalar_lea.vmem [#allocation12], %s5647_s29  ;;  %s5697_s16 = scalar_lea.vmem [#allocation13], %s3930_s4 }
 0x13a   : > { %p993_p0 = scmp.lt.s32.totalorder %s6232_s19, 1  ;;  %p3938_p10 = scmp.ne.s32.totalorder %s6232_s19, 0 }
 0x13b   : > { %vm1024_vm0 = vcmask (!%p3938_p10), 261120  }
 0x13c   : > { %s5658_s21 = scalar_select %p993_p0, %s6232_s19, 1 }
 0x13d   : > { %1021 = sbr.rel (%p3938_p10) target bundleno = 331 (0x14b), region = 136 }
 0x13e   : > { %s4035_s15 = sshll.u32 %s5658_s21, 5  ;;  %s4036_s5 = sshll.u32 %s5658_s21, 6 }
 0x13f   : > { %s5665_s9 = scalar_lea.vmem %s6233_s8, %s4035_s15  ;;  %s5670_s12 = scalar_lea.vmem %s6234_s26, %s4036_s5 }
 0x140   : > { %s4489_s14 = smul.u32 6, %s5658_s21  ;;  %s1009_s6 = scalar_lea.vmem %s6235_s23, %s5658_s21 }
 0x141   : > { %s5680_s25 = scalar_lea.vmem %s6236_s10, %s4036_s5  ;;  %s836_s26 = scalar_lea.vmem [#allocation10], %s5647_s29 }
 0x142   : > { %s5689_s20 = scalar_lea.vmem %s6238_s11, %s4489_s14  ;;  %s5699_s23 = scalar_lea.vmem [#allocation14], %s3928_s18 }
 0x143   : > { %s6239_s5 = sld [smem:[#allocation26_spill]] (!%p3938_p10) }
 0x149   : > { %v1022_v0 = vld [vmem:[%s6239_s5] sm:$0xff]  ;;  %v1023_v1 = vld [vmem:[%s6239_s5 + $0x8] sm:$0xff] }
 0x14a   : > { %1025 = vst.msk [vmem:[#allocation2] sm:$0xff] %vm1024_vm0, %v1022_v0  ;;  %1026 = vst.msk [vmem:[#allocation2 + $0x8] sm:$0xff] %vm1024_vm0, %v1023_v1 }
 0x14b PF: > { %vm1038_vm1 = vcmask 261120   ;;  %v1096_v16 = vld [vmem:[%s5665_s9] sm:$0xff]  ;;  %v1097_v17 = vld [vmem:[%s5665_s9 + $0x8] sm:$0xff]  ;;  %v1098_v18 = vld [vmem:[%s5665_s9 + $0x10] sm:$0xff]  ;;  %s6240_s19 = scalar_lea.vmem [#allocation8], %s5647_s29  ;;  %vm1199_vm6 = vcmask 64512  }
 0x14c   : > { %v4345_v19 = vpack.c.bf16 %v1097_v17, %v1096_v16  ;;  %v1099_v20 = vld [vmem:[%s5665_s9 + $0x18] sm:$0xff]  ;;  %v3940_v39 = vld [vmem:[%s5689_s20] ss:$0 sm:$0xff]  ;;  %v3941_v41 = vld [vmem:[%s5689_s20 + $0x1] ss:$0 sm:$0xff]  ;;  %s5162_s18 = smov 88  }
 0x14d   : > { %v4349_v21 = vpack.c.bf16 %v1099_v20, %v1098_v18  ;;  %v3942_v48 = vld [vmem:[%s6240_s19] ss:$0 sm:$0xff]  ;;  %s5163_s4 = smov 96   ;;  %s5164_s9 = smov 120   ;;  %vm5750_vm7 = vmpackc.low %vm1199_vm6, %vm1199_vm6  ;;  %v5766_v1 = vld [vmem:[#allocation3 + $0x8] sm:$0xff]  ;;  %vm1283_vm8 = vcmask 130048  }
 0x14e   : > { %4346 = vmatprep.subr.bf16.mxu1 %v4345_v19  ;;  %s5165_s24 = smov 56   ;;  %s5166_s28 = smov 64   ;;  %vm2021_vm9 = vcmask 195584  }
 0x14f   : > { %4348 = vmatpush3.bf16.msra.mxu1 %v4345_v19  ;;  %s5167_s10 = smov 80   ;;  %s5168_s3 = smov 112  }
 0x150   : > { %4350 = vmatprep.subr.bf16.mxu1 %v4349_v21  ;;  %s5169_s17 = smov 48   ;;  %s5170_s8 = smov 104  }
 0x151   : > { %v5708_v2 = vld [vmem:[#allocation2] sm:$0xff]  ;;  %v5710_v3 = vld [vmem:[#allocation2 + $0x8] sm:$0xff]  ;;  %s5171_s7 = smov 72   ;;  %s5172_s22 = smov 40  }
 0x152   : > { %v1039_v4 = vsel %vm1038_vm1, %v5708_v2, 0.0  ;;  %v1042_v5 = vsel %vm1038_vm1, %v5710_v3, 0.0  ;;  %s5173_s11 = smov 8   ;;  %s5174_s14 = smov 16  }
 0x153   : > { %1040 = vadd.xlane.f32.xlu0 %v1039_v4  ;;  %4352 = vmatpush3.bf16.msra.mxu1 %v4349_v21  ;;  %v5768_v4 = vld [vmem:[#allocation3] sm:$0xff]  ;;  %s5175_s19 = smov 24  }
 0x157   : > { %1043 = vadd.xlane.f32.xlu0 %v1042_v5 }
 0x1e0   : > { %v1041_v6 = vpop.xlane.xlu0 %1040 }
 0x1e1   : > { %v1046_v7 = vmul.f32 0.03125, %v1041_v6 }
 0x1e3   : > { %v1048_v8 = vsub.f32 %v5708_v2, %v1046_v7 }
 0x1e4   : > { %v1044_v9 = vpop.xlane.xlu0 %1043 }
 0x1e5   : > { %v1047_v10 = vmul.f32 0.03125, %v1044_v9  ;;  %v1050_v11 = vmul.f32 %v1048_v8, %v1048_v8 }
 0x1e7   : > { %v1049_v12 = vsub.f32 %v5710_v3, %v1047_v10  ;;  %v1052_v13 = vsel %vm1038_vm1, %v1050_v11, 0.0 }
 0x1e8   : > { %1053 = vadd.xlane.f32.xlu1 %v1052_v13 }
 0x1e9   : > { %v1051_v14 = vmul.f32 %v1049_v12, %v1049_v12 }
 0x1eb   : > { %v1055_v15 = vsel %vm1038_vm1, %v1051_v14, 0.0 }
 0x1ec   : > { %1056 = vadd.xlane.f32.xlu1 %v1055_v15 }
 0x275   : > { %v1054_v22 = vpop.xlane.xlu1 %1053 }
 0x276   : > { %v1058_v23 = vmul.f32 0.032258064, %v1054_v22 }
 0x278   : > { %4697 = vrsqrt.f32 %v1058_v23  ;;  %vm1062_vm2 = vcmp.eq.f32.partialorder %v1058_v23, inf  ;;  %v1065_v28 = vand.u32 2147483648, %v1058_v23  ;;  %vm1064_vm3 = vcmp.eq.f32.partialorder %v1058_v23, 0.0 }
 0x279   : > { %v1057_v24 = vpop.xlane.xlu1 %1056 }
 0x27a   : > { %v1059_v25 = vmul.f32 0.032258064, %v1057_v24 }
 0x27c   : > { %4699 = vrsqrt.f32 %v1059_v25  ;;  %vm1069_vm4 = vcmp.eq.f32.partialorder %v1059_v25, inf  ;;  %v1072_v34 = vand.u32 2147483648, %v1059_v25  ;;  %vm1071_vm5 = vcmp.eq.f32.partialorder %v1059_v25, 0.0 }
 0x282   : > { %v4698_v26 = vpop.eup %4697 }
 0x283   : > { %v1061_v27 = vmul.f32 %v4698_v26, %v1058_v23 }
 0x285   : > { %v1063_v29 = vsel %vm1062_vm2, %v1058_v23, %v1061_v27 }
 0x286   : > { %v4700_v30 = vpop.eup %4699  ;;  %v1066_v31 = vsel %vm1064_vm3, %v1065_v28, %v1063_v29  ;;  %vm3441_vm3 = vcmask 523264  }
 0x287   : > { %v1068_v32 = vmul.f32 %v4700_v30, %v1059_v25  ;;  %v1074_v33 = vadd.f32 1e-06, %v1066_v31 }
 0x289   : > { %v1070_v35 = vsel %vm1069_vm4, %v1059_v25, %v1068_v32  ;;  %4701 = vrcp.f32 %v1074_v33 }
 0x28a   : > { %v1073_v36 = vsel %vm1071_vm5, %v1072_v34, %v1070_v35 }
 0x28b   : > { %v1075_v37 = vadd.f32 1e-06, %v1073_v36 }
 0x28d   : > { %4703 = vrcp.f32 %v1075_v37 }
 0x293   : > { %v4702_v38 = vpop.eup %4701 }
 0x294   : > { %v1078_v40 = vmul.f32 %v4702_v38, %v1048_v8 }
 0x296   : > { %v1086_v42 = vmul.f32 %v3940_v39, %v1078_v40 }
 0x297   : > { %v4704_v43 = vpop.eup %4703 }
 0x298   : > { %v1079_v44 = vmul.f32 %v4704_v43, %v1049_v12  ;;  %v1094_v45 = vadd.f32 %v3941_v41, %v1086_v42 }
 0x29a   : > { %v1087_v46 = vmul.f32 %v3940_v39, %v1079_v44  ;;  %4156 = vmatprep.mubr.msk.f32.mxu1 %vm1038_vm1, %v1094_v45 }
 0x29c   : > { %v1095_v47 = vadd.f32 %v3941_v41, %v1087_v46 }
 0x29e   : > { %4157 = vmatmul.mubr.msk.f32.vlgmr.msra.gmra.mrb[0].mxu1 %vm1038_vm1, %v1095_v47 }
 0x371   : > { %v4158_v49 = vpop.f32.mrb[0].mxu1 }
 0x372   : > { %v5730_v50 = vadd.f32 %v4158_v49, %v3942_v48  ;;  %v1179_v51 = vpop.f32.mrb[1].mxu1 }
 0x373   : > { %v5732_v52 = vadd.f32 %v3942_v48, %v1179_v51 }
 0x375   : > { %4163 = vmatprep.mubr.msk.f32.mxu1 %vm1199_vm6, %v5732_v52  ;;  %v5738_v53 = vpack.i.bf16 %v5730_v50, %v5732_v52 }
 0x377   : > { %4628 = vrot.lane.b32.xlu1 %v5738_v53, %s5162_s18  ;;  %4623 = vrot.lane.b32.xlu0 %v5738_v53, %s5163_s4 }
 0x37b   : > { %1393 = vrot.lane.b32.xlu1 %v5732_v52, %s5164_s9 }
 0x37f   : > { %1395 = vrot.lane.b32.xlu1 %v5730_v50, %s5164_s9 }
 0x3e9   : > { %v4629_v54 = vpop.permute.xlu1 %4628  ;;  %v4624_v55 = vpop.permute.xlu0 %4623 }
 0x3ea   : > { %v4631_v56 = vunpack.i.h.bf16 %v4629_v54  ;;  %v4630_v57 = vunpack.i.l.bf16 %v4629_v54  ;;  %v4626_v58 = vunpack.i.h.bf16 %v4624_v55  ;;  %v4625_v59 = vunpack.i.l.bf16 %v4624_v55 }
 0x3ec   : > { %v4353_v61 = vpack.c.bf16 %v4626_v58, %v4625_v59  ;;  %v4363_v62 = vpack.c.bf16 %v4631_v56, %v4630_v57 }
 0x3ed   : > { %v1394_v63 = vpop.permute.xlu1 %1393 }
 0x3ee   : > { %4355 = vmatprep.subr.msk.bf16.mxu1 %vm5750_vm7, %v4353_v61 }
 0x3ef   : > { %4358 = vmatpush3.bf16.xpose.msk.msra.mxu1 %vm5750_vm7, %v4353_v61 }
 0x3f0   : > { %4365 = vmatprep.subr.msk.bf16.mxu1 %vm5750_vm7, %v4363_v62 }
 0x3f1   : > { %v1396_v0 = vpop.permute.xlu1 %1395 }
 0x3f6   : > { %4164 = vmatmul.mubr.msk.f32.vlgmr.msra.gmra.mrb[2].mxu1 %vm1199_vm6, %v5730_v50 }
 0x3f7   : > { %4368 = vmatpush3.bf16.xpose.msk.msra.mxu1 %vm5750_vm7, %v4363_v62  ;;  %4177 = vmatprep.mubr.msk.f32.mxu1 %vm1199_vm6, %v1394_v63 }
 0x3fe   : > { %4178 = vmatmul.mubr.msk.f32.vlgmr.msra.gmra.mrb[4].mxu1 %vm1199_vm6, %v1396_v0 }
 0x4c9   : > { %v4165_v5 = vpop.f32.mrb[2].mxu1 }
 0x4ca   : > { %v1280_v6 = vadd.f32 %v4165_v5, %v5766_v1  ;;  %v1274_v7 = vpop.f32.mrb[3].mxu1 }
 0x4cb   : > { %v1275_v8 = vadd.f32 %v1274_v7, %v5768_v4 }
 0x4cc   : > { %v1287_v9 = vsel %vm1283_vm8, %v1280_v6, -inf }
 0x4cd   : > { %1288 = vmax.xlane.f32.xlu1 %v1287_v9  ;;  %v1284_v10 = vsel %vm1283_vm8, %v1275_v8, -inf }
 0x4ce   : > { %1285 = vmax.xlane.f32.xlu0 %v1284_v10 }
 0x4d1   : > { %v4179_v11 = vpop.f32.mrb[4].mxu1 }
 0x4d2   : > { %v1475_v12 = vpop.f32.mrb[5].mxu1  ;;  %v1481_v14 = vadd.f32 %v4179_v11, %v5766_v1 }
 0x4d3   : > { %v1476_v13 = vadd.f32 %v1475_v12, %v5768_v4 }
 0x4d4   : > { %v1487_v16 = vsel %vm1283_vm8, %v1481_v14, -inf }
 0x4d5   : > { %v1484_v15 = vsel %vm1283_vm8, %v1476_v13, -inf }
 0x4d6   : > { %1485 = vmax.xlane.f32.xlu0 %v1484_v15 }
 0x4da   : > { %1488 = vmax.xlane.f32.xlu0 %v1487_v16 }
 0x55a   : > { %v1289_v17 = vpop.xlane.xlu1 %1288 }
 0x55b   : > { %v1291_v18 = vsub.f32 %v1280_v6, %v1289_v17  ;;  %v1286_v19 = vpop.xlane.xlu0 %1285 }
 0x55c   : > { %v1290_v20 = vsub.f32 %v1275_v8, %v1286_v19 }
 0x55d   : > { %v1294_v21 = vmul.f32 1.442695, %v1291_v18 }
 0x55e   : > { %v1292_v22 = vmul.f32 1.442695, %v1290_v20 }
 0x55f   : > { %4705 = vpow2.f32 %v1294_v21 }
 0x560   : > { %4707 = vpow2.f32 %v1292_v22 }
 0x563   : > { %v1486_v23 = vpop.xlane.xlu0 %1485 }
 0x564   : > { %v1490_v24 = vsub.f32 %v1476_v13, %v1486_v23 }
 0x566   : > { %v1492_v25 = vmul.f32 1.442695, %v1490_v24 }
 0x567   : > { %v1489_v26 = vpop.xlane.xlu0 %1488 }
 0x568   : > { %4709 = vpow2.f32 %v1492_v25  ;;  %v1491_v27 = vsub.f32 %v1481_v14, %v1489_v26 }
 0x569   : > { %v4706_v28 = vpop.eup %4705 }
 0x56a   : > { %v4708_v29 = vpop.eup %4707  ;;  %v1494_v30 = vmul.f32 1.442695, %v1491_v27  ;;  %v1299_v31 = vsel %vm1283_vm8, %v4706_v28, 0.0 }
 0x56b   : > { %1300 = vadd.xlane.f32.xlu1 %v1299_v31  ;;  %v1296_v32 = vsel %vm1283_vm8, %v4708_v29, 0.0 }
 0x56c   : > { %4711 = vpow2.f32 %v1494_v30  ;;  %1297 = vadd.xlane.f32.xlu0 %v1296_v32 }
 0x572   : > { %v4710_v33 = vpop.eup %4709 }
 0x573   : > { %v1496_v34 = vsel %vm1283_vm8, %v4710_v33, 0.0 }
 0x574   : > { %1497 = vadd.xlane.f32.xlu0 %v1496_v34 }
 0x576   : > { %v4712_v35 = vpop.eup %4711 }
 0x577   : > { %v1499_v36 = vsel %vm1283_vm8, %v4712_v35, 0.0 }
 0x578   : > { %1500 = vadd.xlane.f32.xlu1 %v1499_v36 }
 0x589   : > { %4638 = vrot.lane.b32.xlu1 %v5738_v53, %s5165_s24 }
 0x58a   : > { %4633 = vrot.lane.b32.xlu0 %v5738_v53, %s5166_s28 }
 0x58d   : > { %4643 = vrot.lane.b32.xlu1 %v5738_v53, %s5167_s10 }
 0x58e   : > { %1595 = vrot.lane.b32.xlu0 %v5730_v50, %s5168_s3 }
 0x591   : > { %1593 = vrot.lane.b32.xlu1 %v5732_v52, %s5168_s3 }
 0x5f8   : > { %v1301_v38 = vpop.xlane.xlu1 %1300 }
 0x5f9   : > { %v1298_v37 = vpop.xlane.xlu0 %1297 }
 0x5fa   : > { %4713 = vrcp.f32 %v1298_v37 }
 0x5fb   : > { %4715 = vrcp.f32 %v1301_v38 }
 0x601   : > { %v1498_v39 = vpop.xlane.xlu0 %1497 }
 0x602   : > { %4717 = vrcp.f32 %v1498_v39 }
 0x604   : > { %v4714_v40 = vpop.eup %4713 }
 0x605   : > { %v1501_v41 = vpop.xlane.xlu1 %1500  ;;  %v4634_v42 = vpop.permute.xlu0 %4633  ;;  %v1304_v43 = vmul.f32 %v4714_v40, %v4708_v29 }
 0x606   : > { %4719 = vrcp.f32 %v1501_v41  ;;  %v4636_v44 = vunpack.i.h.bf16 %v4634_v42  ;;  %v4635_v45 = vunpack.i.l.bf16 %v4634_v42  ;;  %v4716_v47 = vpop.eup %4715 }
 0x607   : > { %4170 = vmatprep.mubr.msk.f32.mxu0 %vm1283_vm8, %v1304_v43  ;;  %v1305_v56 = vmul.f32 %v4716_v47, %v4706_v28 }
 0x608   : > { %v4359_v46 = vpack.c.bf16 %v4636_v44, %v4635_v45 }
 0x609   : > { %v4639_v48 = vpop.permute.xlu1 %4638  ;;  %v1596_v6 = vpop.permute.xlu0 %1595 }
 0x60a   : > { %v4641_v49 = vunpack.i.h.bf16 %v4639_v48  ;;  %v4640_v51 = vunpack.i.l.bf16 %v4639_v48  ;;  %4360 = vmatprep.subr.bf16.mxu0 %v4359_v46 }
 0x60b   : > { %4362 = vmatpush3.bf16.msra.mxu0 %v4359_v46 }
 0x60c   : > { %v4718_v54 = vpop.eup %4717  ;;  %v4369_v55 = vpack.c.bf16 %v4641_v49, %v4640_v51 }
 0x60d   : > { %v4644_v57 = vpop.permute.xlu1 %4643  ;;  %v1504_v58 = vmul.f32 %v4718_v54, %v4710_v33 }
 0x60e   : > { %v4646_v59 = vunpack.i.h.bf16 %v4644_v57  ;;  %v4645_v61 = vunpack.i.l.bf16 %v4644_v57  ;;  %4171 = vmatmul.mubr.msk.f32.vlgmr.msra.gmra.mrb[0].mxu0 %vm1283_vm8, %v1305_v56  ;;  %4370 = vmatprep.subr.bf16.mxu0 %v4369_v55 }
 0x60f   : > { %4372 = vmatpush3.bf16.msra.mxu0 %v4369_v55  ;;  %4184 = vmatprep.mubr.msk.f32.mxu0 %vm1283_vm8, %v1504_v58 }
 0x610   : > { %v4720_v62 = vpop.eup %4719  ;;  %v4373_v63 = vpack.c.bf16 %v4646_v59, %v4645_v61 }
 0x611   : > { %v1505_v0 = vmul.f32 %v4720_v62, %v4712_v35  ;;  %v1594_v5 = vpop.permute.xlu1 %1593 }
 0x612   : > { %4375 = vmatprep.subr.msk.bf16.mxu0 %vm5750_vm7, %v4373_v63 }
 0x613   : > { %4185 = vmatmul.mubr.msk.f32.vlgmr.msra.gmra.mrb[2].mxu0 %vm1283_vm8, %v1505_v0 }
 0x614   : > { %4191 = vmatprep.mubr.msk.f32.mxu0 %vm1199_vm6, %v1594_v5 }
 0x618   : > { %4378 = vmatpush3.bf16.xpose.msk.msra.mxu0 %vm5750_vm7, %v4373_v63 }
 0x61f   : > { %4192 = vmatmul.mubr.msk.f32.vlgmr.msra.gmra.mrb[4].mxu0 %vm1199_vm6, %v1596_v6 }
 0x6e1   : > { %v5800_v7 = vpop.f32.mrb[0].mxu0 }
 0x6e2   : > { %v5802_v8 = vpop.f32.mrb[1].mxu0 }
 0x6e6   : > { %v5804_v9 = vpop.f32.mrb[2].mxu0 }
 0x6e7   : > { %v5806_v10 = vpop.f32.mrb[3].mxu0 }
 0x6f2   : > { %v4193_v11 = vpop.f32.mrb[4].mxu0 }
 0x6f3   : > { %v1681_v12 = vadd.f32 %v4193_v11, %v5766_v1  ;;  %v1675_v13 = vpop.f32.mrb[5].mxu0 }
 0x6f4   : > { %v1676_v14 = vadd.f32 %v1675_v13, %v5768_v4  ;;  %v1188_v13 = vld [vmem:[%s5670_s12] sm:$0xff] }
 0x6f5   : > { %v1687_v15 = vsel %vm1283_vm8, %v1681_v12, -inf }
 0x6f6   : > { %1688 = vmax.xlane.f32.xlu0 %v1687_v15  ;;  %v1684_v16 = vsel %vm1283_vm8, %v1676_v14, -inf  ;;  %v1190_v15 = vld [vmem:[%s5670_s12 + $0x10] sm:$0xff] }
 0x6f7   : > { %1685 = vmax.xlane.f32.xlu1 %v1684_v16 }
 0x708   : > { %4648 = vrot.lane.b32.xlu1 %v5738_v53, %s5169_s17  ;;  %s6243_s17 = sld [smem:[#allocation27_spill]] }
 0x70c   : > { %1793 = vrot.lane.b32.xlu1 %v5732_v52, %s5170_s8 }
 0x710   : > { %1795 = vrot.lane.b32.xlu1 %v5730_v50, %s5170_s8 }
 0x783   : > { %v1689_v17 = vpop.xlane.xlu0 %1688 }
 0x784   : > { %v1691_v18 = vsub.f32 %v1681_v12, %v1689_v17  ;;  %v1686_v19 = vpop.xlane.xlu1 %1685  ;;  %v1191_v17 = vld [vmem:[%s5670_s12 + $0x18] sm:$0xff] }
 0x785   : > { %v1690_v20 = vsub.f32 %v1676_v14, %v1686_v19  ;;  %v1189_v14 = vld [vmem:[%s5670_s12 + $0x8] sm:$0xff] }
 0x786   : > { %v1694_v21 = vmul.f32 1.442695, %v1691_v18  ;;  %v4393_v16 = vpack.c.bf16 %v1189_v14, %v1188_v13  ;;  %v4397_v18 = vpack.c.bf16 %v1191_v17, %v1190_v15 }
 0x787   : > { %v1692_v22 = vmul.f32 1.442695, %v1690_v20 }
 0x788   : > { %4721 = vpow2.f32 %v1694_v21  ;;  %v4649_v23 = vpop.permute.xlu1 %4648 }
 0x789   : > { %v4651_v24 = vunpack.i.h.bf16 %v4649_v23  ;;  %v4650_v25 = vunpack.i.l.bf16 %v4649_v23  ;;  %4723 = vpow2.f32 %v1692_v22 }
 0x78b   : > { %v4379_v26 = vpack.c.bf16 %v4651_v24, %v4650_v25 }
 0x78c   : > { %v1794_v39 = vpop.permute.xlu1 %1793 }
 0x78d   : > { %4380 = vmatprep.subr.bf16.mxu1 %v4379_v26 }
 0x78e   : > { %4382 = vmatpush3.bf16.msra.mxu1 %v4379_v26 }
 0x790   : > { %v1796_v40 = vpop.permute.xlu1 %1795 }
 0x792   : > { %v4722_v27 = vpop.eup %4721 }
 0x793   : > { %v1699_v52 = vsel %vm1283_vm8, %v4722_v27, 0.0  ;;  %v4724_v28 = vpop.eup %4723 }
 0x794   : > { %1700 = vadd.xlane.f32.xlu0 %v1699_v52  ;;  %v1696_v50 = vsel %vm1283_vm8, %v4724_v28, 0.0 }
 0x798   : > { %1697 = vadd.xlane.f32.xlu0 %v1696_v50 }
 0x7ae   : > { %4653 = vrot.lane.b32.xlu0 %v5738_v53, %s5171_s7 }
 0x821   : > { %v1701_v29 = vpop.xlane.xlu0 %1700 }
 0x822   : > { %4725 = vrcp.f32 %v1701_v29 }
 0x825   : > { %v1698_v30 = vpop.xlane.xlu0 %1697 }
 0x826   : > { %4727 = vrcp.f32 %v1698_v30  ;;  %v3969_v30 = vld [vmem:[%s5697_s16] ss:$0 sm:$0xff] }
 0x829   : > { %v4654_v31 = vpop.permute.xlu0 %4653 }
 0x82a   : > { %v4656_v32 = vunpack.i.h.bf16 %v4654_v31  ;;  %v4655_v33 = vunpack.i.l.bf16 %v4654_v31 }
 0x82c   : > { %v4383_v34 = vpack.c.bf16 %v4656_v32, %v4655_v33  ;;  %v4726_v35 = vpop.eup %4725 }
 0x82d   : > { %v1705_v38 = vmul.f32 %v4726_v35, %v4722_v27 }
 0x82e   : > { %4385 = vmatprep.subr.msk.bf16.mxu1 %vm5750_vm7, %v4383_v34 }
 0x830   : > { %v4728_v36 = vpop.eup %4727 }
 0x831   : > { %v1704_v37 = vmul.f32 %v4728_v36, %v4724_v28 }
 0x833   : > { %4198 = vmatprep.mubr.msk.f32.mxu1 %vm1283_vm8, %v1704_v37 }
 0x834   : > { %4199 = vmatmul.mubr.msk.f32.vlgmr.msra.gmra.mrb[6].mxu1 %vm1283_vm8, %v1705_v38 }
 0x835   : > { %4388 = vmatpush3.bf16.xpose.msk.msra.mxu1 %vm5750_vm7, %v4383_v34  ;;  %4205 = vmatprep.mubr.msk.f32.mxu1 %vm1199_vm6, %v1794_v39 }
 0x83c   : > { %4206 = vmatmul.mubr.msk.f32.vlgmr.msra.gmra.mrb[8].mxu1 %vm1199_vm6, %v1796_v40 }
 0x907   : > { %v4200_v41 = vpop.f32.mrb[6].mxu1 }
 0x908   : > { %v1784_v42 = vpop.f32.mrb[7].mxu1 }
 0x90f   : > { %v4207_v43 = vpop.f32.mrb[8].mxu1 }
 0x910   : > { %v1881_v44 = vadd.f32 %v4207_v43, %v5766_v1  ;;  %v1875_v45 = vpop.f32.mrb[9].mxu1 }
 0x911   : > { %v1876_v46 = vadd.f32 %v1875_v45, %v5768_v4  ;;  %v2265_v45 = vld [vmem:[%s5694_s13] sm:$0xff] }
 0x912   : > { %v1887_v47 = vsel %vm1283_vm8, %v1881_v44, -inf }
 0x913   : > { %1888 = vmax.xlane.f32.xlu0 %v1887_v47  ;;  %v1884_v48 = vsel %vm1283_vm8, %v1876_v46, -inf }
 0x914   : > { %1885 = vmax.xlane.f32.xlu1 %v1884_v48  ;;  %v2267_v48 = vld [vmem:[%s5694_s13 + $0x10] sm:$0xff] }
 0x925   : > { %4658 = vrot.lane.b32.xlu1 %v5738_v53, %s5172_s22 }
 0x929   : > { %1997 = vrot.lane.b32.xlu1 %v5804_v9, %s5173_s11 }
 0x92d   : > { %2003 = vrot.lane.b32.xlu1 %v1784_v42, %s5174_s14 }
 0x931   : > { %2005 = vrot.lane.b32.xlu1 %v4200_v41, %s5174_s14 }
 0x9a0   : > { %v1889_v1 = vpop.xlane.xlu0 %1888 }
 0x9a1   : > { %v1891_v4 = vsub.f32 %v1881_v44, %v1889_v1  ;;  %v1886_v49 = vpop.xlane.xlu1 %1885  ;;  %v2268_v1 = vld [vmem:[%s5694_s13 + $0x18] sm:$0xff] }
 0x9a2   : > { %v1890_v51 = vsub.f32 %v1876_v46, %v1886_v49  ;;  %v2266_v46 = vld [vmem:[%s5694_s13 + $0x8] sm:$0xff] }
 0x9a3   : > { %v1894_v54 = vmul.f32 1.442695, %v1891_v4  ;;  %v4409_v47 = vpack.c.bf16 %v2266_v46, %v2265_v45  ;;  %v4413_v4 = vpack.c.bf16 %v2268_v1, %v2267_v48  ;;  %v1029_v49 = vld [vmem:[%s6243_s17] sm:$0xff] }
 0x9a4   : > { %v1892_v55 = vmul.f32 1.442695, %v1890_v51  ;;  %v2173_v51 = vld [vmem:[%s5691_s27] sm:$0xff] }
 0x9a5   : > { %v4659_v56 = vpop.permute.xlu1 %4658 }
 0x9a6   : > { %4729 = vpow2.f32 %v1892_v55  ;;  %v4661_v57 = vunpack.i.h.bf16 %v4659_v56  ;;  %v4660_v58 = vunpack.i.l.bf16 %v4659_v56  ;;  %v2175_v55 = vld [vmem:[%s5691_s27 + $0x10] sm:$0xff]  ;;  %v2176_v56 = vld [vmem:[%s5691_s27 + $0x18] sm:$0xff] }
 0x9a7   : > { %4731 = vpow2.f32 %v1894_v54  ;;  %v2174_v54 = vld [vmem:[%s5691_s27 + $0x8] sm:$0xff] }
 0x9a8   : > { %v4389_v53 = vpack.c.bf16 %v4661_v57, %v4660_v58  ;;  %v1030_v57 = vld [vmem:[%s6243_s17 + $0x8] sm:$0xff]  ;;  %v4401_v58 = vpack.c.bf16 %v2174_v54, %v2173_v51 }
 0x9a9   : > { %v1998_v20 = vpop.permute.xlu1 %1997 }
 0x9aa   : > { %4390 = vmatprep.subr.bf16.mxu0 %v4389_v53  ;;  %v2018_v26 = vsel %vm1199_vm6, %v5800_v7, %v1998_v20  ;;  %4402 = vmatprep.subr.bf16.mxu1 %v4401_v58 }
 0x9ab   : > { %4392 = vmatpush3.bf16.msra.mxu0 %v4389_v53  ;;  %v4405_v53 = vpack.c.bf16 %v2176_v56, %v2175_v55  ;;  %4404 = vmatpush3.bf16.msra.mxu1 %v4401_v58 }
 0x9ac   : > { %4394 = vmatprep.subr.bf16.mxu0 %v4393_v16 }
 0x9ad   : > { %v2004_v21 = vpop.permute.xlu1 %2003  ;;  %4406 = vmatprep.subr.bf16.mxu1 %v4405_v53 }
 0x9af   : > { %4408 = vmatpush3.bf16.msra.mxu1 %v4405_v53 }
 0x9b0   : > { %v4730_v59 = vpop.eup %4729 }
 0x9b1   : > { %v1896_v61 = vsel %vm1283_vm8, %v4730_v59, 0.0  ;;  %v4732_v62 = vpop.eup %4731  ;;  %v2006_v23 = vpop.permute.xlu1 %2005 }
 0x9b2   : > { %1897 = vadd.xlane.f32.xlu0 %v1896_v61  ;;  %v1899_v63 = vsel %vm1283_vm8, %v4732_v62, 0.0  ;;  %v2020_v28 = vsel %vm1283_vm8, %v2018_v26, %v2006_v23 }
 0x9b6   : > { %1900 = vadd.xlane.f32.xlu0 %v1899_v63 }
 0x9cc   : > { %1995 = vrot.lane.b32.xlu0 %v5806_v10, %s5173_s11 }
 0xa3f   : > { %v1898_v0 = vpop.xlane.xlu0 %1897 }
 0xa40   : > { %4733 = vrcp.f32 %v1898_v0 }
 0xa43   : > { %v1901_v5 = vpop.xlane.xlu0 %1900 }
 0xa44   : > { %4735 = vrcp.f32 %v1901_v5 }
 0xa47   : > { %v1996_v22 = vpop.permute.xlu0 %1995 }
 0xa48   : > { %v2017_v24 = vsel %vm1199_vm6, %v5802_v8, %v1996_v22 }
 0xa49   : > { %v2019_v27 = vsel %vm1283_vm8, %v2017_v24, %v2004_v21  ;;  %v3975_v21 = vld [vmem:[%s5689_s20 + $0x3] ss:$0 sm:$0xff] }
 0xa4a   : > { %v4734_v6 = vpop.eup %4733 }
 0xa4b   : > { %v1904_v9 = vmul.f32 %v4734_v6, %v4730_v59 }
 0xa4d   : > { %4212 = vmatprep.mubr.msk.f32.mxu0 %vm1283_vm8, %v1904_v9 }
 0xa4e   : > { %v4736_v11 = vpop.eup %4735 }
 0xa4f   : > { %v1905_v12 = vmul.f32 %v4736_v11, %v4732_v62 }
 0xa51   : > { %4213 = vmatmul.mubr.msk.f32.vlgmr.msra.gmra.mrb[6].mxu0 %vm1283_vm8, %v1905_v12 }
 0xa52   : > { %4396 = vmatpush3.bf16.msra.mxu0 %v4393_v16 }
 0xa53   : > { %4398 = vmatprep.subr.bf16.mxu0 %v4397_v18 }
 0xa56   : > { %4400 = vmatpush3.bf16.msra.mxu0 %v4397_v18 }
 0xa57   : > { %4410 = vmatprep.subr.bf16.mxu0 %v4409_v47 }
 0xb24   : > { %v4214_v10 = vpop.f32.mrb[6].mxu0 }
 0xb25   : > { %2013 = vrot.lane.b32.xlu1 %v4214_v10, %s5175_s19  ;;  %v1984_v19 = vpop.f32.mrb[7].mxu0 }
 0xb26   : > { %2011 = vrot.lane.b32.xlu0 %v1984_v19, %s5175_s19  ;;  %v3974_v19 = vld [vmem:[%s5689_s20 + $0x2] ss:$0 sm:$0xff] }
 0xb97   : > { %v2014_v25 = vpop.permute.xlu1 %2013 }
 0xb98   : > { %v2012_v52 = vpop.permute.xlu0 %2011  ;;  %v2023_v29 = vsel %vm2021_vm9, %v2020_v28, %v2014_v25 }
 0xb99   : > { %v2022_v50 = vsel %vm2021_vm9, %v2019_v27, %v2012_v52  ;;  %v3979_v52 = vld [vmem:[%s853_s0] ss:$0 sm:$0xff] }
 0xb9a   : > { %4223 = vmatprep.mubr.msk.f32.mxu0 %vm1038_vm1, %v2022_v50 }
 0xb9b   : > { %4224 = vmatmul.mubr.msk.f32.vlgmr.msra.gmra.mrb[8].mxu0 %vm1038_vm1, %v2023_v29 }
 0xb9c   : > { %4412 = vmatpush3.bf16.msra.mxu0 %v4409_v47  ;;  %4245 = vmatprep.mubr.msk.f32.mxu0 %vm1038_vm1, %v1029_v49 }
 0xb9d   : > { %4414 = vmatprep.subr.bf16.mxu0 %v4413_v4 }
 0xba0   : > { %4416 = vmatpush3.bf16.msra.mxu0 %v4413_v4 }
 0xba3   : > { %4246 = vmatmul.mubr.msk.f32.vlgmr.msra.gmra.mrb[10].mxu0 %vm1038_vm1, %v1030_v57 }
 0xc6e   : > { %v4225_v8 = vpop.f32.mrb[8].mxu0 }
 0xc6f   : > { %v2108_v31 = vadd.f32 %v4225_v8, %v3969_v30  ;;  %v2102_v32 = vpop.f32.mrb[9].mxu0 }
 0xc70   : > { %v2103_v33 = vadd.f32 %v3969_v30, %v2102_v32 }
 0xc71   : > { %v5862_v7 = vadd.f32 %v2108_v31, %v5710_v3 }
 0xc72   : > { %v5865_v34 = vadd.f32 %v2103_v33, %v5708_v2 }
 0xc73   : > { %v2120_v35 = vsel %vm1038_vm1, %v5862_v7, 0.0 }
 0xc74   : > { %2121 = vadd.xlane.f32.xlu1 %v2120_v35  ;;  %v2117_v36 = vsel %vm1038_vm1, %v5865_v34, 0.0 }
 0xc75   : > { %2118 = vadd.xlane.f32.xlu0 %v2117_v36 }
 0xc76   : > { %v4247_v28 = vpop.f32.mrb[10].mxu0 }
 0xc77   : > { %v2354_v50 = vadd.f32 %v4247_v28, %v3979_v52  ;;  %v2348_v29 = vpop.f32.mrb[11].mxu0 }
 0xc78   : > { %v2349_v30 = vadd.f32 %v3979_v52, %v2348_v29 }
 0xc7a   : > { %v4417_v8 = vpack.c.bf16 %v2354_v50, %v2349_v30  ;;  %v5897_v31 = vpack.i.bf16 %v2354_v50, %v2349_v30 }
 0xc7c   : > { %4419 = vmatprep.subr.msk.bf16.mxu1 %vm5750_vm7, %v4417_v8 }
 0xd01   : > { %v2122_v37 = vpop.xlane.xlu1 %2121 }
 0xd02   : > { %v2124_v38 = vmul.f32 0.03125, %v2122_v37  ;;  %v2119_v39 = vpop.xlane.xlu0 %2118  ;;  %v3976_v37 = vld [vmem:[%s836_s26] ss:$0 sm:$0xff] }
 0xd03   : > { %v2123_v3 = vmul.f32 0.03125, %v2119_v39 }
 0xd04   : > { %v2126_v40 = vsub.f32 %v5862_v7, %v2124_v38 }
 0xd05   : > { %v2125_v2 = vsub.f32 %v5865_v34, %v2123_v3 }
 0xd06   : > { %v2128_v43 = vmul.f32 %v2126_v40, %v2126_v40 }
 0xd07   : > { %v2127_v41 = vmul.f32 %v2125_v2, %v2125_v2 }
 0xd08   : > { %v2132_v44 = vsel %vm1038_vm1, %v2128_v43, 0.0  ;;  %v5927_v43 = vld [vmem:[#allocation6] sm:$0xff] }
 0xd09   : > { %v2129_v42 = vsel %vm1038_vm1, %v2127_v41, 0.0 }
 0xd0a   : > { %2130 = vadd.xlane.f32.xlu0 %v2129_v42  ;;  %v5925_v42 = vld [vmem:[#allocation6 + $0x8] sm:$0xff] }
 0xd0e   : > { %2133 = vadd.xlane.f32.xlu0 %v2132_v44 }
 0xd24   : > { %4663 = vrot.lane.b32.xlu0 %v5897_v31, %s5164_s9 }
 0xd97   : > { %v2131_v59 = vpop.xlane.xlu0 %2130 }
 0xd98   : > { %v2135_v61 = vmul.f32 0.032258064, %v2131_v59 }
 0xd9a   : > { %4737 = vrsqrt.f32 %v2135_v61  ;;  %vm2139_vm10 = vcmp.eq.f32.partialorder %v2135_v61, inf  ;;  %v2142_v6 = vand.u32 2147483648, %v2135_v61  ;;  %vm2141_vm11 = vcmp.eq.f32.partialorder %v2135_v61, 0.0 }
 0xd9b   : > { %v2134_v62 = vpop.xlane.xlu0 %2133 }
 0xd9c   : > { %v2136_v63 = vmul.f32 0.032258064, %v2134_v62 }
 0xd9e   : > { %4739 = vrsqrt.f32 %v2136_v63  ;;  %vm2146_vm12 = vcmp.eq.f32.partialorder %v2136_v63, inf  ;;  %v2149_v15 = vand.u32 2147483648, %v2136_v63  ;;  %vm2148_vm13 = vcmp.eq.f32.partialorder %v2136_v63, 0.0 }
 0xd9f   : > { %v4664_v32 = vpop.permute.xlu0 %4663 }
 0xda0   : > { %v4666_v33 = vunpack.i.h.bf16 %v4664_v32  ;;  %v4665_v35 = vunpack.i.l.bf16 %v4664_v32 }
 0xda2   : > { %v4427_v36 = vpack.c.bf16 %v4666_v33, %v4665_v35 }
 0xda4   : > { %v4738_v0 = vpop.eup %4737 }
 0xda5   : > { %v2138_v5 = vmul.f32 %v4738_v0, %v2135_v61 }
 0xda7   : > { %v2140_v9 = vsel %vm2139_vm10, %v2135_v61, %v2138_v5 }
 0xda8   : > { %v4740_v11 = vpop.eup %4739  ;;  %v2143_v12 = vsel %vm2141_vm11, %v2142_v6, %v2140_v9 }
 0xda9   : > { %v2151_v13 = vadd.f32 1e-06, %v2143_v12  ;;  %v2145_v14 = vmul.f32 %v4740_v11, %v2136_v63 }
 0xdab   : > { %4741 = vrcp.f32 %v2151_v13  ;;  %v2147_v16 = vsel %vm2146_vm12, %v2136_v63, %v2145_v14 }
 0xdac   : > { %v2150_v17 = vsel %vm2148_vm13, %v2149_v15, %v2147_v16 }
 0xdad   : > { %v2152_v18 = vadd.f32 1e-06, %v2150_v17 }
 0xdaf   : > { %4743 = vrcp.f32 %v2152_v18 }
 0xdb5   : > { %v4742_v10 = vpop.eup %4741 }
 0xdb6   : > { %v2155_v20 = vmul.f32 %v4742_v10, %v2125_v2 }
 0xdb8   : > { %v2163_v22 = vmul.f32 %v3974_v19, %v2155_v20 }
 0xdb9   : > { %v4744_v23 = vpop.eup %4743 }
 0xdba   : > { %v2156_v24 = vmul.f32 %v4744_v23, %v2126_v40  ;;  %v2171_v25 = vadd.f32 %v3975_v21, %v2163_v22 }
 0xdbc   : > { %v2164_v26 = vmul.f32 %v3974_v19, %v2156_v24  ;;  %4234 = vmatprep.mubr.msk.f32.mxu1 %vm1038_vm1, %v2171_v25 }
 0xdbe   : > { %v2172_v27 = vadd.f32 %v3975_v21, %v2164_v26 }
 0xdc0   : > { %4235 = vmatmul.mubr.msk.f32.vlgmr.msra.gmra.mrb[10].mxu1 %vm1038_vm1, %v2172_v27 }
 0xdc1   : > { %4422 = vmatpush3.bf16.xpose.msk.msra.mxu1 %vm5750_vm7, %v4417_v8 }
 0xdc2   : > { %4429 = vmatprep.subr.msk.bf16.mxu1 %vm5750_vm7, %v4427_v36 }
 0xe93   : > { %v4236_v38 = vpop.f32.mrb[10].mxu1 }
 0xe94   : > { %v2256_v39 = vpop.f32.mrb[11].mxu1  ;;  %v5911_v40 = vadd.f32 %v4236_v38, %v3976_v37 }
 0xe95   : > { %v5909_v3 = vadd.f32 %v3976_v37, %v2256_v39 }
 0xe97   : > { %2560 = vrot.lane.b32.xlu1 %v5909_v3, %s5164_s9  ;;  %4252 = vmatprep.mubr.msk.f32.mxu1 %vm1199_vm6, %v5909_v3 }
 0xe98   : > { %4253 = vmatmul.mubr.msk.f32.vlgmr.msra.gmra.mrb[12].mxu1 %vm1199_vm6, %v5911_v40 }
 0xe99   : > { %4432 = vmatpush3.bf16.xpose.msk.msra.mxu1 %vm5750_vm7, %v4427_v36 }
 0xe9b   : > { %2562 = vrot.lane.b32.xlu1 %v5911_v40, %s5164_s9 }
 0xf09   : > { %v2561_v2 = vpop.permute.xlu1 %2560 }
 0xf0a   : > { %4266 = vmatprep.mubr.msk.f32.mxu1 %vm1199_vm6, %v2561_v2 }
 0xf0d   : > { %v2563_v41 = vpop.permute.xlu1 %2562 }
 0xf0e   : > { %4267 = vmatmul.mubr.msk.f32.vlgmr.msra.gmra.mrb[14].mxu1 %vm1199_vm6, %v2563_v41 }
 0xf6b   : > { %v4254_v44 = vpop.f32.mrb[12].mxu1 }
 0xf6c   : > { %v2448_v45 = vadd.f32 %v4254_v44, %v5925_v42  ;;  %v2442_v46 = vpop.f32.mrb[13].mxu1 }
 0xf6d   : > { %v2443_v47 = vadd.f32 %v2442_v46, %v5927_v43 }
 0xf6e   : > { %v2454_v48 = vsel %vm1283_vm8, %v2448_v45, -inf }
 0xf6f   : > { %2455 = vmax.xlane.f32.xlu0 %v2454_v48  ;;  %v2451_v1 = vsel %vm1283_vm8, %v2443_v47, -inf }
 0xf70   : > { %2452 = vmax.xlane.f32.xlu1 %v2451_v1 }
 0xf81   : > { %4668 = vrot.lane.b32.xlu1 %v5897_v31, %s5163_s4 }
 0xfe1   : > { %v4268_v4 = vpop.f32.mrb[14].mxu1 }
 0xfe2   : > { %v2642_v49 = vpop.f32.mrb[15].mxu1  ;;  %v2648_v54 = vadd.f32 %v4268_v4, %v5925_v42 }
 0xfe3   : > { %v2643_v51 = vadd.f32 %v2642_v49, %v5927_v43 }
 0xfe4   : > { %v2654_v56 = vsel %vm1283_vm8, %v2648_v54, -inf }
 0xfe5   : > { %v2651_v55 = vsel %vm1283_vm8, %v2643_v51, -inf }
 0xfe6   : > { %2652 = vmax.xlane.f32.xlu0 %v2651_v55 }
 0xfea   : > { %2655 = vmax.xlane.f32.xlu0 %v2654_v56 }
 0xffc   : > { %v2456_v57 = vpop.xlane.xlu0 %2455 }
 0xffd   : > { %v2458_v58 = vsub.f32 %v2448_v45, %v2456_v57  ;;  %v2453_v53 = vpop.xlane.xlu1 %2452 }
 0xffe   : > { %v2457_v59 = vsub.f32 %v2443_v47, %v2453_v53 }
 0xfff   : > { %v2461_v61 = vmul.f32 1.442695, %v2458_v58 }
0x1000   : > { %v2459_v62 = vmul.f32 1.442695, %v2457_v59 }
0x1001   : > { %4745 = vpow2.f32 %v2461_v61  ;;  %v4669_v63 = vpop.permute.xlu1 %4668 }
0x1002   : > { %4747 = vpow2.f32 %v2459_v62  ;;  %v4671_v0 = vunpack.i.h.bf16 %v4669_v63  ;;  %v4670_v5 = vunpack.i.l.bf16 %v4669_v63 }
0x1004   : > { %v4423_v6 = vpack.c.bf16 %v4671_v0, %v4670_v5 }
0x1006   : > { %4424 = vmatprep.subr.bf16.mxu0 %v4423_v6 }
0x1007   : > { %4426 = vmatpush3.bf16.msra.mxu0 %v4423_v6 }
0x100b   : > { %v4746_v9 = vpop.eup %4745 }
0x100c   : > { %v4748_v11 = vpop.eup %4747  ;;  %v2466_v12 = vsel %vm1283_vm8, %v4746_v9, 0.0 }
0x100d   : > { %2467 = vadd.xlane.f32.xlu0 %v2466_v12  ;;  %v2463_v13 = vsel %vm1283_vm8, %v4748_v11, 0.0 }
0x100e   : > { %2464 = vadd.xlane.f32.xlu1 %v2463_v13 }
0x101f   : > { %4678 = vrot.lane.b32.xlu1 %v5897_v31, %s5168_s3 }
0x1023   : > { %2760 = vrot.lane.b32.xlu1 %v5909_v3, %s5168_s3 }
0x1073   : > { %v2653_v14 = vpop.xlane.xlu0 %2652 }
0x1074   : > { %v2657_v15 = vsub.f32 %v2643_v51, %v2653_v14 }
0x1076   : > { %v2659_v16 = vmul.f32 1.442695, %v2657_v15 }
0x1077   : > { %v2656_v17 = vpop.xlane.xlu0 %2655 }
0x1078   : > { %4749 = vpow2.f32 %v2659_v16  ;;  %v2658_v18 = vsub.f32 %v2648_v54, %v2656_v17 }
0x107a   : > { %v2661_v10 = vmul.f32 1.442695, %v2658_v18 }
0x107c   : > { %4751 = vpow2.f32 %v2661_v10 }
0x1082   : > { %v4750_v19 = vpop.eup %4749 }
0x1083   : > { %v2663_v20 = vsel %vm1283_vm8, %v4750_v19, 0.0 }
0x1084   : > { %2664 = vadd.xlane.f32.xlu1 %v2663_v20 }
0x1086   : > { %v4752_v21 = vpop.eup %4751 }
0x1087   : > { %v2666_v22 = vsel %vm1283_vm8, %v4752_v21, 0.0 }
0x1088   : > { %2667 = vadd.xlane.f32.xlu0 %v2666_v22 }
0x1095   : > { %2762 = vrot.lane.b32.xlu1 %v5911_v40, %s5168_s3 }
0x109a   : > { %v2468_v23 = vpop.xlane.xlu0 %2467 }
0x109b   : > { %4753 = vrcp.f32 %v2468_v23  ;;  %v2465_v24 = vpop.xlane.xlu1 %2464 }
0x109c   : > { %4755 = vrcp.f32 %v2465_v24 }
0x109e   : > { %4673 = vrot.lane.b32.xlu0 %v5897_v31, %s5162_s18 }
0x109f   : > { %v4679_v28 = vpop.permute.xlu1 %4678 }
0x10a0   : > { %v4681_v32 = vunpack.i.h.bf16 %v4679_v28  ;;  %v4680_v33 = vunpack.i.l.bf16 %v4679_v28 }
0x10a2   : > { %v4437_v2 = vpack.c.bf16 %v4681_v32, %v4680_v33 }
0x10a3   : > { %v2761_v50 = vpop.permute.xlu1 %2760 }
0x10a5   : > { %v4754_v25 = vpop.eup %4753 }
0x10a6   : > { %v4756_v26 = vpop.eup %4755  ;;  %v2472_v52 = vmul.f32 %v4754_v25, %v4746_v9 }
0x10a7   : > { %v2471_v27 = vmul.f32 %v4756_v26, %v4748_v11 }
0x10a9   : > { %4259 = vmatprep.mubr.msk.f32.mxu0 %vm1283_vm8, %v2471_v27 }
0x10aa   : > { %4260 = vmatmul.mubr.msk.f32.vlgmr.msra.gmra.mrb[12].mxu0 %vm1283_vm8, %v2472_v52 }
0x1111   : > { %v2665_v29 = vpop.xlane.xlu1 %2664 }
0x1112   : > { %4757 = vrcp.f32 %v2665_v29 }
0x1115   : > { %v2668_v30 = vpop.xlane.xlu0 %2667  ;;  %v2763_v45 = vpop.permute.xlu1 %2762 }
0x1116   : > { %4759 = vrcp.f32 %v2668_v30 }
0x1119   : > { %v4674_v8 = vpop.permute.xlu0 %4673 }
0x111a   : > { %v4676_v35 = vunpack.i.h.bf16 %v4674_v8  ;;  %v4675_v36 = vunpack.i.l.bf16 %v4674_v8 }
0x111c   : > { %v4758_v37 = vpop.eup %4757  ;;  %v4433_v38 = vpack.c.bf16 %v4676_v35, %v4675_v36 }
0x111d   : > { %v2671_v39 = vmul.f32 %v4758_v37, %v4750_v19 }
0x111e   : > { %4434 = vmatprep.subr.bf16.mxu0 %v4433_v38 }
0x111f   : > { %4436 = vmatpush3.bf16.msra.mxu0 %v4433_v38  ;;  %4273 = vmatprep.mubr.msk.f32.mxu0 %vm1283_vm8, %v2671_v39 }
0x1120   : > { %v4760_v41 = vpop.eup %4759  ;;  %4439 = vmatprep.subr.msk.bf16.mxu0 %vm5750_vm7, %v4437_v2 }
0x1121   : > { %v2672_v44 = vmul.f32 %v4760_v41, %v4752_v21 }
0x1123   : > { %4274 = vmatmul.mubr.msk.f32.vlgmr.msra.gmra.mrb[14].mxu0 %vm1283_vm8, %v2672_v44 }
0x1124   : > { %4280 = vmatprep.mubr.msk.f32.mxu0 %vm1199_vm6, %v2761_v50 }
0x1128   : > { %4442 = vmatpush3.bf16.xpose.msk.msra.mxu0 %vm5750_vm7, %v4437_v2 }
0x112f   : > { %4281 = vmatmul.mubr.msk.f32.vlgmr.msra.gmra.mrb[16].mxu0 %vm1199_vm6, %v2763_v45 }
0x117d   : > { %v5961_v46 = vpop.f32.mrb[12].mxu0 }
0x117e   : > { %v5963_v47 = vpop.f32.mrb[13].mxu0 }
0x11f6   : > { %v5965_v48 = vpop.f32.mrb[14].mxu0 }
0x11f7   : > { %v2751_v1 = vpop.f32.mrb[15].mxu0 }
0x1202   : > { %v4282_v4 = vpop.f32.mrb[16].mxu0 }
0x1203   : > { %v2848_v49 = vadd.f32 %v4282_v4, %v5925_v42  ;;  %v2842_v51 = vpop.f32.mrb[17].mxu0  ;;  %v3982_v4 = vld [vmem:[%s5670_s12 + $0x20] sm:$0xff] }
0x1204   : > { %v2843_v54 = vadd.f32 %v2842_v51, %v5927_v43  ;;  %v3984_v51 = vld [vmem:[%s5670_s12 + $0x30] sm:$0xff] }
0x1205   : > { %v2854_v55 = vsel %vm1283_vm8, %v2848_v49, -inf }
0x1206   : > { %2855 = vmax.xlane.f32.xlu1 %v2854_v55  ;;  %v2851_v56 = vsel %vm1283_vm8, %v2843_v54, -inf  ;;  %v3985_v55 = vld [vmem:[%s5670_s12 + $0x38] sm:$0xff] }
0x1207   : > { %2852 = vmax.xlane.f32.xlu0 %v2851_v56  ;;  %v4461_v56 = vpack.c.bf16 %v3985_v55, %v3984_v51 }
0x1217   : > { %4688 = vrot.lane.b32.xlu1 %v5897_v31, %s5170_s8 }
0x121b   : > { %2960 = vrot.lane.b32.xlu1 %v5909_v3, %s5170_s8 }
0x121f   : > { %2962 = vrot.lane.b32.xlu1 %v5911_v40, %s5170_s8 }
0x1293   : > { %v2856_v57 = vpop.xlane.xlu1 %2855 }
0x1294   : > { %v2858_v58 = vsub.f32 %v2848_v49, %v2856_v57  ;;  %v2853_v53 = vpop.xlane.xlu0 %2852  ;;  %v3983_v49 = vld [vmem:[%s5670_s12 + $0x28] sm:$0xff] }
0x1295   : > { %v2857_v59 = vsub.f32 %v2843_v54, %v2853_v53  ;;  %v4457_v54 = vpack.c.bf16 %v3983_v49, %v3982_v4 }
0x1296   : > { %v2861_v61 = vmul.f32 1.442695, %v2858_v58 }
0x1297   : > { %v2859_v62 = vmul.f32 1.442695, %v2857_v59  ;;  %v4689_v9 = vpop.permute.xlu1 %4688 }
0x1298   : > { %4761 = vpow2.f32 %v2861_v61  ;;  %v4691_v12 = vunpack.i.h.bf16 %v4689_v9  ;;  %v4690_v13 = vunpack.i.l.bf16 %v4689_v9 }
0x1299   : > { %4763 = vpow2.f32 %v2859_v62 }
0x129a   : > { %v4447_v17 = vpack.c.bf16 %v4691_v12, %v4690_v13  ;;  %v4011_v12 = vld [vmem:[%s5697_s16 + $0x1] ss:$0 sm:$0xff] }
0x129b   : > { %v2961_v21 = vpop.permute.xlu1 %2960 }
0x129f   : > { %v2963_v22 = vpop.permute.xlu1 %2962 }
0x12a2   : > { %v4762_v63 = vpop.eup %4761 }
0x12a3   : > { %v2866_v0 = vsel %vm1283_vm8, %v4762_v63, 0.0  ;;  %v4764_v5 = vpop.eup %4763 }
0x12a4   : > { %2867 = vadd.xlane.f32.xlu0 %v2866_v0  ;;  %v2863_v6 = vsel %vm1283_vm8, %v4764_v5, 0.0 }
0x12a8   : > { %2864 = vadd.xlane.f32.xlu0 %v2863_v6 }
0x12be   : > { %4683 = vrot.lane.b32.xlu0 %v5897_v31, %s5167_s10 }
0x1331   : > { %v2868_v3 = vpop.xlane.xlu0 %2867 }
0x1332   : > { %4765 = vrcp.f32 %v2868_v3 }
0x1335   : > { %v2865_v40 = vpop.xlane.xlu0 %2864 }
0x1336   : > { %4767 = vrcp.f32 %v2865_v40 }
0x1339   : > { %v4684_v11 = vpop.permute.xlu0 %4683 }
0x133a   : > { %v4686_v14 = vunpack.i.h.bf16 %v4684_v11  ;;  %v4685_v15 = vunpack.i.l.bf16 %v4684_v11 }
0x133c   : > { %v4443_v16 = vpack.c.bf16 %v4686_v14, %v4685_v15  ;;  %v4766_v18 = vpop.eup %4765 }
0x133d   : > { %v2872_v20 = vmul.f32 %v4766_v18, %v4762_v63 }
0x133e   : > { %4444 = vmatprep.subr.bf16.mxu1 %v4443_v16 }
0x133f   : > { %4446 = vmatpush3.bf16.msra.mxu1 %v4443_v16 }
0x1340   : > { %v4768_v10 = vpop.eup %4767  ;;  %4449 = vmatprep.subr.msk.bf16.mxu1 %vm5750_vm7, %v4447_v17 }
0x1341   : > { %v2871_v19 = vmul.f32 %v4768_v10, %v4764_v5 }
0x1343   : > { %4287 = vmatprep.mubr.msk.f32.mxu1 %vm1283_vm8, %v2871_v19 }
0x1344   : > { %4288 = vmatmul.mubr.msk.f32.vlgmr.msra.gmra.mrb[16].mxu1 %vm1283_vm8, %v2872_v20 }
0x1345   : > { %4294 = vmatprep.mubr.msk.f32.mxu1 %vm1199_vm6, %v2961_v21 }
0x1348   : > { %4452 = vmatpush3.bf16.xpose.msk.msra.mxu1 %vm5750_vm7, %v4447_v17 }
0x134f   : > { %4295 = vmatmul.mubr.msk.f32.vlgmr.msra.gmra.mrb[18].mxu1 %vm1199_vm6, %v2963_v22 }
0x1417   : > { %v4289_v23 = vpop.f32.mrb[16].mxu1 }
0x1418   : > { %v2951_v24 = vpop.f32.mrb[17].mxu1 }
0x1422   : > { %v4296_v25 = vpop.f32.mrb[18].mxu1 }
0x1423   : > { %v3048_v26 = vadd.f32 %v4296_v25, %v5925_v42  ;;  %v3042_v27 = vpop.f32.mrb[19].mxu1 }
0x1424   : > { %v3043_v52 = vadd.f32 %v3042_v27, %v5927_v43  ;;  %v3340_v27 = vld [vmem:[%s5699_s23 + $0x8] sm:$0xff] }
0x1425   : > { %v3054_v28 = vsel %vm1283_vm8, %v3048_v26, -inf }
0x1426   : > { %3055 = vmax.xlane.f32.xlu1 %v3054_v28  ;;  %v3051_v50 = vsel %vm1283_vm8, %v3043_v52, -inf }
0x1427   : > { %3052 = vmax.xlane.f32.xlu0 %v3051_v50  ;;  %v3342_v50 = vld [vmem:[%s5699_s23 + $0x18] sm:$0xff] }
0x1437   : > { %3162 = vrot.lane.b32.xlu1 %v2751_v1, %s5173_s11 }
0x143b   : > { %3164 = vrot.lane.b32.xlu1 %v5965_v48, %s5173_s11 }
0x143f   : > { %3170 = vrot.lane.b32.xlu1 %v2951_v24, %s5174_s14 }
0x14b3   : > { %v3056_v60 = vpop.xlane.xlu1 %3055 }
0x14b4   : > { %v3058_v29 = vsub.f32 %v3048_v26, %v3056_v60  ;;  %v3053_v30 = vpop.xlane.xlu0 %3052  ;;  %v3339_v26 = vld [vmem:[%s5699_s23] sm:$0xff] }
0x14b5   : > { %v3057_v42 = vsub.f32 %v3043_v52, %v3053_v30  ;;  %v3341_v52 = vld [vmem:[%s5699_s23 + $0x10] sm:$0xff]  ;;  %v4465_v28 = vpack.c.bf16 %v3340_v27, %v3339_v26 }
0x14b6   : > { %v3061_v8 = vmul.f32 1.442695, %v3058_v29  ;;  %v4469_v60 = vpack.c.bf16 %v3342_v50, %v3341_v52  ;;  %v3433_v29 = vld [vmem:[%s5680_s25] sm:$0xff]  ;;  %v3434_v30 = vld [vmem:[%s5680_s25 + $0x8] sm:$0xff] }
0x14b7   : > { %v3059_v32 = vmul.f32 1.442695, %v3057_v42  ;;  %v3163_v53 = vpop.permute.xlu1 %3162  ;;  %4466 = vmatprep.subr.bf16.mxu1 %v4465_v28  ;;  %v3435_v42 = vld [vmem:[%s5680_s25 + $0x10] sm:$0xff] }
0x14b8   : > { %4769 = vpow2.f32 %v3061_v8  ;;  %v3184_v63 = vsel %vm1199_vm6, %v5963_v47, %v3163_v53  ;;  %4468 = vmatpush3.bf16.msra.mxu1 %v4465_v28  ;;  %v4473_v8 = vpack.c.bf16 %v3434_v30, %v3433_v29 }
0x14b9   : > { %4771 = vpow2.f32 %v3059_v32  ;;  %4470 = vmatprep.subr.bf16.mxu1 %v4469_v60  ;;  %v3436_v32 = vld [vmem:[%s5680_s25 + $0x18] sm:$0xff] }
0x14bb   : > { %v3165_v59 = vpop.permute.xlu1 %3164 }
0x14bc   : > { %v3185_v5 = vsel %vm1199_vm6, %v5961_v46, %v3165_v59  ;;  %4472 = vmatpush3.bf16.msra.mxu1 %v4469_v60  ;;  %v4017_v59 = vld [vmem:[%s5689_s20 + $0x5] ss:$0 sm:$0xff] }
0x14bf   : > { %v3171_v62 = vpop.permute.xlu1 %3170 }
0x14c0   : > { %v3186_v6 = vsel %vm1283_vm8, %v3184_v63, %v3171_v62 }
0x14c2   : > { %v4770_v43 = vpop.eup %4769 }
0x14c3   : > { %v3066_v33 = vsel %vm1283_vm8, %v4770_v43, 0.0  ;;  %v4772_v35 = vpop.eup %4771 }
0x14c4   : > { %3067 = vadd.xlane.f32.xlu0 %v3066_v33  ;;  %v3063_v36 = vsel %vm1283_vm8, %v4772_v35, 0.0  ;;  %v3437_v33 = vld [vmem:[%s5680_s25 + $0x20] sm:$0xff] }
0x14c8   : > { %3064 = vadd.xlane.f32.xlu0 %v3063_v36 }
0x14de   : > { %4693 = vrot.lane.b32.xlu0 %v5897_v31, %s5171_s7 }
0x14e2   : > { %3172 = vrot.lane.b32.xlu0 %v4289_v23, %s5174_s14 }
0x1551   : > { %v3068_v37 = vpop.xlane.xlu0 %3067 }
0x1552   : > { %4773 = vrcp.f32 %v3068_v37 }
0x1555   : > { %v3065_v38 = vpop.xlane.xlu0 %3064 }
0x1556   : > { %4775 = vrcp.f32 %v3065_v38 }
0x1559   : > { %v4694_v39 = vpop.permute.xlu0 %4693 }
0x155a   : > { %v4696_v2 = vunpack.i.h.bf16 %v4694_v39  ;;  %v4695_v41 = vunpack.i.l.bf16 %v4694_v39 }
0x155c   : > { %v4453_v44 = vpack.c.bf16 %v4696_v2, %v4695_v41  ;;  %v4774_v45 = vpop.eup %4773 }
0x155d   : > { %v3072_v31 = vmul.f32 %v4774_v45, %v4770_v43  ;;  %v3173_v61 = vpop.permute.xlu0 %3172  ;;  %v4477_v43 = vpack.c.bf16 %v3436_v32, %v3435_v42 }
0x155e   : > { %4454 = vmatprep.subr.bf16.mxu0 %v4453_v44  ;;  %v3187_v40 = vsel %vm1283_vm8, %v3185_v5, %v3173_v61 }
0x155f   : > { %4456 = vmatpush3.bf16.msra.mxu0 %v4453_v44 }
0x1560   : > { %v4776_v48 = vpop.eup %4775  ;;  %4458 = vmatprep.subr.bf16.mxu0 %v4457_v54 }
0x1561   : > { %v3071_v1 = vmul.f32 %v4776_v48, %v4772_v35  ;;  %v3438_v35 = vld [vmem:[%s5680_s25 + $0x28] sm:$0xff] }
0x1562   : > { %v4481_v36 = vpack.c.bf16 %v3438_v35, %v3437_v33 }
0x1563   : > { %4301 = vmatprep.mubr.msk.f32.mxu0 %vm1283_vm8, %v3071_v1 }
0x1564   : > { %4302 = vmatmul.mubr.msk.f32.vlgmr.msra.gmra.mrb[18].mxu0 %vm1283_vm8, %v3072_v31 }
0x1565   : > { %4460 = vmatpush3.bf16.msra.mxu0 %v4457_v54 }
0x1566   : > { %4462 = vmatprep.subr.bf16.mxu0 %v4461_v56 }
0x1569   : > { %4464 = vmatpush3.bf16.msra.mxu0 %v4461_v56 }
0x156a   : > { %4474 = vmatprep.subr.bf16.mxu0 %v4473_v8 }
0x1637   : > { %v4303_v57 = vpop.f32.mrb[18].mxu0 }
0x1638   : > { %3180 = vrot.lane.b32.xlu0 %v4303_v57, %s5175_s19  ;;  %v3151_v58 = vpop.f32.mrb[19].mxu0 }
0x1639   : > { %3178 = vrot.lane.b32.xlu1 %v3151_v58, %s5175_s19  ;;  %v4016_v58 = vld [vmem:[%s5689_s20 + $0x4] ss:$0 sm:$0xff]  ;;  %s6245_s20 = sld [smem:[#allocation42_spill]] }
0x163f   : > { %s6246_s27 = scalar_lea.vmem %s6245_s20, %s5658_s21 }
0x16aa   : > { %v3181_v0 = vpop.permute.xlu0 %3180 }
0x16ab   : > { %v3179_v3 = vpop.permute.xlu1 %3178  ;;  %v3189_v11 = vsel %vm2021_vm9, %v3187_v40, %v3181_v0  ;;  %v3440_v40 = vld [vmem:[%s5680_s25 + $0x38] sm:$0xff] }
0x16ac   : > { %v3188_v9 = vsel %vm2021_vm9, %v3186_v6, %v3179_v3  ;;  %v3439_v3 = vld [vmem:[%s5680_s25 + $0x30] sm:$0xff] }
0x16ad   : > { %4312 = vmatprep.mubr.msk.f32.mxu0 %vm1038_vm1, %v3188_v9  ;;  %v4485_v9 = vpack.c.bf16 %v3440_v40, %v3439_v3 }
0x16ae   : > { %4313 = vmatmul.mubr.msk.f32.vlgmr.msra.gmra.mrb[20].mxu0 %vm1038_vm1, %v3189_v11  ;;  %v4018_v11 = vld [vmem:[%s1009_s6] ss:$0 sm:$0xff]  ;;  %s6247_s6 = sld [smem:[#allocation21_spill]] }
0x16af   : > { %4476 = vmatpush3.bf16.msra.mxu0 %v4473_v8 }
0x16b0   : > { %4478 = vmatprep.subr.bf16.mxu0 %v4477_v43 }
0x16b3   : > { %4480 = vmatpush3.bf16.msra.mxu0 %v4477_v43 }
0x16b4   : > { %4482 = vmatprep.subr.bf16.mxu0 %v4481_v36  ;;  %p4024_p6 = scmp.ne.s32.totalorder %s6247_s6, 1 }
0x16b5   : > { %s6248_s0 = sld [smem:[#allocation43_spill]] (!%p4024_p6)  ;;  %s6249_s18 = sld [smem:[#allocation44_spill]] (!%p4024_p6) }
0x16b7   : > { %4484 = vmatpush3.bf16.msra.mxu0 %v4481_v36 }
0x16b8   : > { %4486 = vmatprep.subr.bf16.mxu0 %v4485_v9 }
0x16bb   : > { %4488 = vmatpush3.bf16.msra.mxu0 %v4485_v9 }
0x1781   : > { %v4314_v13 = vpop.f32.mrb[20].mxu0 }
0x1782   : > { %v3274_v47 = vadd.f32 %v4314_v13, %v4011_v12  ;;  %v3268_v14 = vpop.f32.mrb[21].mxu0 }
0x1783   : > { %v3269_v15 = vadd.f32 %v4011_v12, %v3268_v14 }
0x1784   : > { %v6022_v46 = vadd.f32 %v3274_v47, %v5862_v7 }
0x1785   : > { %v6025_v16 = vadd.f32 %v3269_v15, %v5865_v34 }
0x1786   : > { %v3286_v17 = vsel %vm1038_vm1, %v6022_v46, 0.0 }
0x1787   : > { %3287 = vadd.xlane.f32.xlu0 %v3286_v17  ;;  %v3283_v18 = vsel %vm1038_vm1, %v6025_v16, 0.0 }
0x1788   : > { %3284 = vadd.xlane.f32.xlu1 %v3283_v18 }
0x1814   : > { %v3288_v10 = vpop.xlane.xlu0 %3287 }
0x1815   : > { %v3290_v19 = vmul.f32 0.03125, %v3288_v10  ;;  %v3285_v20 = vpop.xlane.xlu1 %3284  ;;  %v4023_v10 = vld [vmem:[%s6246_s27] ss:$0 sm:$0xff] }
0x1816   : > { %v3289_v7 = vmul.f32 0.03125, %v3285_v20 }
0x1817   : > { %v6032_v21 = vsub.f32 %v6022_v46, %v3290_v19 }
0x1818   : > { %v3291_v34 = vsub.f32 %v6025_v16, %v3289_v7 }
0x1819   : > { %v3294_v24 = vmul.f32 %v6032_v21, %v6032_v21 }
0x181a   : > { %v3293_v22 = vmul.f32 %v3291_v34, %v3291_v34 }
0x181b   : > { %v3298_v25 = vsel %vm1038_vm1, %v3294_v24, 0.0 }
0x181c   : > { %v3295_v23 = vsel %vm1038_vm1, %v3293_v22, 0.0 }
0x181d   : > { %3296 = vadd.xlane.f32.xlu0 %v3295_v23 }
0x1821   : > { %3299 = vadd.xlane.f32.xlu0 %v3298_v25 }
0x18aa   : > { %v3297_v37 = vpop.xlane.xlu0 %3296 }
0x18ab   : > { %v3301_v38 = vmul.f32 0.032258064, %v3297_v37 }
0x18ad   : > { %4777 = vrsqrt.f32 %v3301_v38  ;;  %vm3305_vm14 = vcmp.eq.f32.partialorder %v3301_v38, inf  ;;  %v3308_v45 = vand.u32 2147483648, %v3301_v38  ;;  %vm3307_vm15 = vcmp.eq.f32.partialorder %v3301_v38, 0.0 }
0x18ae   : > { %v3300_v39 = vpop.xlane.xlu0 %3299 }
0x18af   : > { %v3302_v2 = vmul.f32 0.032258064, %v3300_v39 }
0x18b1   : > { %4779 = vrsqrt.f32 %v3302_v2  ;;  %vm3312_vm0 = vcmp.eq.f32.partialorder %v3302_v2, inf  ;;  %v3315_v51 = vand.u32 2147483648, %v3302_v2  ;;  %vm3314_vm2 = vcmp.eq.f32.partialorder %v3302_v2, 0.0 }
0x18b7   : > { %v4778_v41 = vpop.eup %4777 }
0x18b8   : > { %v3304_v44 = vmul.f32 %v4778_v41, %v3301_v38 }
0x18ba   : > { %v3306_v48 = vsel %vm3305_vm14, %v3301_v38, %v3304_v44 }
0x18bb   : > { %v4780_v1 = vpop.eup %4779  ;;  %v3309_v31 = vsel %vm3307_vm15, %v3308_v45, %v3306_v48 }
0x18bc   : > { %v3317_v4 = vadd.f32 1e-06, %v3309_v31  ;;  %v3311_v49 = vmul.f32 %v4780_v1, %v3302_v2  ;;  %v4025_v1 = vld [vmem:[%s6248_s0] ss:$0 sm:$0xff] (!%p4024_p6) }
0x18be   : > { %4781 = vrcp.f32 %v3317_v4  ;;  %v3313_v54 = vsel %vm3312_vm0, %v3302_v2, %v3311_v49  ;;  %v4026_v4 = vld [vmem:[%s6249_s18] ss:$0 sm:$0xff] (!%p4024_p6) }
0x18bf   : > { %v3316_v55 = vsel %vm3314_vm2, %v3315_v51, %v3313_v54 }
0x18c0   : > { %v3318_v56 = vadd.f32 1e-06, %v3316_v55 }
0x18c2   : > { %4783 = vrcp.f32 %v3318_v56 }
0x18c8   : > { %v4782_v57 = vpop.eup %4781 }
0x18c9   : > { %v3321_v53 = vmul.f32 %v4782_v57, %v3291_v34 }
0x18cb   : > { %v3329_v61 = vmul.f32 %v4016_v58, %v3321_v53 }
0x18cc   : > { %v4784_v62 = vpop.eup %4783 }
0x18cd   : > { %v3322_v63 = vmul.f32 %v4784_v62, %v6032_v21  ;;  %v3337_v0 = vadd.f32 %v4017_v59, %v3329_v61 }
0x18cf   : > { %v3330_v5 = vmul.f32 %v4016_v58, %v3322_v63  ;;  %4323 = vmatprep.mubr.msk.f32.mxu1 %vm1038_vm1, %v3337_v0 }
0x18d1   : > { %v3338_v6 = vadd.f32 %v4017_v59, %v3330_v5 }
0x18d3   : > { %4324 = vmatmul.mubr.msk.f32.vlgmr.msra.gmra.mrb[20].mxu1 %vm1038_vm1, %v3338_v6 }
0x19a6   : > { %v4325_v12 = vpop.f32.mrb[20].mxu1 }
0x19a7   : > { %v3428_v13 = vadd.f32 %v4325_v12, %v4018_v11  ;;  %v3422_v47 = vpop.f32.mrb[21].mxu1 }
0x19a8   : > { %v3423_v14 = vadd.f32 %v4018_v11, %v3422_v47 }
0x19a9   : > { %v3432_v17 = vmax.f32 %v3428_v13, 0.0 }
0x19aa   : > { %v3431_v15 = vmax.f32 %v3423_v14, 0.0 }
0x19ac   : > { %4342 = vmatprep.mubr.msk.f32.mxu0 %vm3441_vm3, %v3431_v15 }
0x19ad   : > { %4343 = vmatmul.mubr.msk.f32.vlgmr.msra.gmra.mrb[22].mxu0 %vm3441_vm3, %v3432_v17 }
0x1a80   : > { %v4344_v18 = vpop.f32.mrb[22].mxu0  ;;  %3539 = sbr.rel (%p4024_p6) target bundleno = 7123 (0x1bd3), region = 140 }
0x1a81   : > { %v3524_v19 = vadd.f32 %v4344_v18, %v6022_v46  ;;  %v3514_v20 = vpop.f32.mrb[23].mxu0 }
0x1a82   : > { %v3523_v7 = vadd.f32 %v3514_v20, %v6025_v16 }
0x1a83   : > { %v3533_v21 = vadd.f32 %v4023_v10, %v3524_v19 }
0x1a84   : > { %v3532_v34 = vadd.f32 %v4023_v10, %v3523_v7 }
0x1a85   : > { %3535 = vst.msk [vmem:[#allocation2 + $0x8] sm:$0xff] %vm1038_vm1, %v3533_v21  ;;  %v3545_v23 = vsel (!%p4024_p6), %vm1038_vm1, %v3533_v21, 0.0 }
0x1a86   : > { %3534 = vst.msk [vmem:[#allocation2] sm:$0xff] %vm1038_vm1, %v3532_v34  ;;  %v3542_v22 = vsel (!%p4024_p6), %vm1038_vm1, %v3532_v34, 0.0 }
0x1a87   : > { %3543 = vadd.xlane.f32.xlu0 %v3542_v22 }
0x1a8b   : > { %3546 = vadd.xlane.f32.xlu0 %v3545_v23 }
0x1b14   : > { %v3544_v24 = vpop.xlane.xlu0 %3543 }
0x1b15   : > { %v3548_v46 = vmul.f32 0.03125, %v3544_v24 }
0x1b17   : > { %v3550_v25 = vsub.f32 %v3532_v34, %v3548_v46 }
0x1b18   : > { %v3547_v26 = vpop.xlane.xlu0 %3546 }
0x1b19   : > { %v3549_v16 = vmul.f32 0.03125, %v3547_v26  ;;  %v3552_v27 = vmul.f32 %v3550_v25, %v3550_v25 }
0x1b1b   : > { %v3551_v52 = vsub.f32 %v3533_v21, %v3549_v16  ;;  %v3554_v28 = vsel %vm1038_vm1, %v3552_v27, 0.0 }
0x1b1c   : > { %3555 = vadd.xlane.f32.xlu1 %v3554_v28 }
0x1b1d   : > { %v3553_v50 = vmul.f32 %v3551_v52, %v3551_v52 }
0x1b1f   : > { %v3557_v60 = vsel %vm1038_vm1, %v3553_v50, 0.0 }
0x1b20   : > { %3558 = vadd.xlane.f32.xlu1 %v3557_v60 }
0x1ba9   : > { %v3556_v29 = vpop.xlane.xlu1 %3555 }
0x1baa   : > { %v3560_v30 = vmul.f32 0.032258064, %v3556_v29 }
0x1bac   : > { %4785 = vrsqrt.f32 %v3560_v30  ;;  %vm3564_vm4 = vcmp.eq.f32.partialorder %v3560_v30, inf  ;;  %v3567_v33 = vand.u32 2147483648, %v3560_v30  ;;  %vm3566_vm5 = vcmp.eq.f32.partialorder %v3560_v30, 0.0 }
0x1bad   : > { %v3559_v42 = vpop.xlane.xlu1 %3558 }
0x1bae   : > { %v3561_v8 = vmul.f32 0.032258064, %v3559_v42 }
0x1bb0   : > { %4787 = vrsqrt.f32 %v3561_v8  ;;  %vm3571_vm6 = vcmp.eq.f32.partialorder %v3561_v8, inf  ;;  %v3574_v2 = vand.u32 2147483648, %v3561_v8  ;;  %vm3573_vm7 = vcmp.eq.f32.partialorder %v3561_v8, 0.0 }
0x1bb6   : > { %v4786_v32 = vpop.eup %4785 }
0x1bb7   : > { %v3563_v43 = vmul.f32 %v4786_v32, %v3560_v30 }
0x1bb9   : > { %v3565_v35 = vsel %vm3564_vm4, %v3560_v30, %v3563_v43 }
0x1bba   : > { %v4788_v36 = vpop.eup %4787  ;;  %v3568_v37 = vsel %vm3566_vm5, %v3567_v33, %v3565_v35 }
0x1bbb   : > { %v3576_v38 = vadd.f32 1e-06, %v3568_v37  ;;  %v3570_v39 = vmul.f32 %v4788_v36, %v3561_v8 }
0x1bbd   : > { %4789 = vrcp.f32 %v3576_v38  ;;  %v3572_v41 = vsel %vm3571_vm6, %v3561_v8, %v3570_v39 }
0x1bbe   : > { %v3575_v44 = vsel %vm3573_vm7, %v3574_v2, %v3572_v41 }
0x1bbf   : > { %v3577_v45 = vadd.f32 1e-06, %v3575_v44 }
0x1bc1   : > { %4791 = vrcp.f32 %v3577_v45 }
0x1bc7   : > { %v4790_v48 = vpop.eup %4789 }
0x1bc8   : > { %v3580_v31 = vmul.f32 %v4790_v48, %v3550_v25 }
0x1bca   : > { %v3588_v49 = vmul.f32 %v4025_v1, %v3580_v31 }
0x1bcb   : > { %v4792_v51 = vpop.eup %4791 }
0x1bcc   : > { %v3596_v54 = vadd.f32 %v4026_v4, %v3588_v49  ;;  %v3581_v55 = vmul.f32 %v4792_v51, %v3551_v52 }
0x1bce   : > { %3598 = vst.msk [vmem:[#allocation15] sm:$0xff] %vm1038_vm1, %v3596_v54  ;;  %v3589_v56 = vmul.f32 %v4025_v1, %v3581_v55 }
0x1bd0   : > { %v3597_v57 = vadd.f32 %v4026_v4, %v3589_v56 }
0x1bd2   : > { %3599 = vst.msk [vmem:[#allocation15 + $0x8] sm:$0xff] %vm1038_vm1, %v3597_v57 }
0x1bd3 PF: > { %p4550_p2 = scmp.eq.s32.totalorder %s5307_s2, 1  ;;  %s5176_s4 = smov [#allocation15]  }
0x1bd4   : > { %s3609_s9 = sshll.u32 %s5176_s4, 4  ;;  %s3610_s9 = int_to_ptr.vmem [resolvable:$true] %s3609_s9 }
0x1bd5   : > { %s5059_s10 = scalar_lea.vmem %s3610_s9, 256  ;;  %p5066_p4 = scmp.lt.s32.totalorder %s3610_s9, %s3610_s9 }
0x1bd6   : > { %p5060_p9 = scmp.ne.s32.totalorder %s3610_s9, %s5059_s10  ;;  %p5067_p13 = scmp.lt.s32.totalorder %s5059_s10, %s5059_s10 }
0x1bd8   : > { %p5061_p3 = pnand %p5060_p9, %p4550_p2  ;;  %p5068_p1 = por %p5067_p13, %p5066_p4 }
0x1bda   : > { %p5062_p5 = pneg %p5061_p3 }
0x1bdc   : > { %p5069_p11 = pnand %p5068_p1, %p5062_p5 }
0x1bde   : > { %5072 = shalt.err (!%p5069_p11)
}
0x1bdf   : > { %s6250_s7 = sld [smem:[#allocation45_spill]] }
0x1be5   : > { %s5073_s14 = scalar_lea.hbm %s6250_s7, 256 }
0x1be6   : > { %p5074_p7 = scmp.ne.s32.totalorder %s6250_s7, %s5073_s14  ;;  %p5079_p0 = scmp.lt.u32.totalorder %s5073_s14, %s6250_s7 }
0x1be8   : > { %p5075_p8 = pnand %p5074_p7, %p4550_p2 }
0x1bea   : > { %p5076_p12 = pneg %p5075_p8 }
0x1bec   : > { %p5081_p10 = pnand %p5079_p0, %p5076_p12 }
0x1bee   : > { %5084 = shalt.err (!%p5081_p10)
}
0x1bef   : > { %s5177_s13 = smov 128  }
0x1bf0   : > { %4513 = dma.vmem_to_hbm [thread:$0]  (%p4550_p2), %s3610_s9, 256, %s6250_s7, [#allocation5], %s5177_s13, %s5177_s13, %s5173_s11  }
0x1bf1   : > { %5122 = dma.done.wait (%p4550_p2), [#allocation5], 256  }
0x1bf2   : > { %5124 = vsyncadd (%p4550_p2), [#allocation5], 4294967040 }
0x1bf3 PF: > { %s6251_s15 = sld [smem:[#allocation22_spill]]  ;;  %s6252_s25 = sld [smem:[#allocation20_spill]] }
0x1bf4   : > { %s6253_s20 = sld [smem:[#allocation25_spill]]  ;;  %s6254_s27 = sld [smem:[#allocation24_spill]] }
0x1bf5   : > { %s6255_s0 = smov %s5131_s30  ;;  %s6257_s21 = smov %s5143_s1 }
0x1bf9   : > { %s32_s22 = sadd.s32 1, %s6251_s15   ;;  %s6256_s30 = smov %s6252_s25 }
0x1bfa   : > { %p29_p6 = scmp.ge.s32.totalorder %s32_s22, 4   ;;  %s6258_s1 = smov %s6254_s27 }
0x1bfc   :  { %31 = sbr.rel (!%p29_p6) target bundleno = 26 (0x1a), region = 248 }
0x1c03   :  { %3625 = vsyncpa [#allocation4], 1 }
0x1c04   :  { %3627 = vsyncpa [#allocation4 + $0x1], 1 }
0x1c05   :  { %3628 = vsyncpa [#allocation7], 1 }
0x1c06   :  { %3629 = vsyncpa [#allocation5], 1 }
0x1c07   :  { %3631 = vsyncpa [#allocation5 + $0x1], 1 }

</bundles_post_ra>
